<compile_context>
chip_gen: v5e
topology: v5e:2x2
jax: 0.10.0
libtpu: 0.0.40
codegen_flags: <defaults>
</compile_context>

<pallas_src>
import functools

import jax
import jax.numpy as jnp
import numpy as np
from jax import lax
from jax.experimental import pallas as pl
from jax.experimental.pallas import tpu as pltpu


# -----------------------------------------------------------------------------
# Pallas kernel: full 2-layer LSTM over the sequence + final Linear,
# one invocation, time loop unrolled in-kernel.
# -----------------------------------------------------------------------------
def _lstm_kernel(x_ref,                 # (S, B, I)   whole sequence
                 w0_ref, b0_ref,        # (I+H, 4H), (1, 4H)  layer-0 fused
                 w1_ref, b1_ref,        # (2H,  4H), (1, 4H)  layer-1 fused
                 wlin_ref, blin_ref,    # (H, O), (1, O)      final Linear
                 out_ref):              # (B, O)
    S = x_ref.shape[0]
    B = x_ref.shape[1]
    H = wlin_ref.shape[0]

    # Load weights once; they stay resident across the unrolled loop.
    w0 = w0_ref[...]
    b0 = b0_ref[...]
    w1 = w1_ref[...]
    b1 = b1_ref[...]

    def cell(xh, c, w, b):
        # PyTorch LSTM cell (gate order i, f, g, o) with fused input/hidden
        # matmul: gates = [x, h] @ [W_ih^T; W_hh^T] + (b_ih + b_hh)
        gates = jnp.dot(xh, w, preferred_element_type=jnp.float32) + b
        i = jax.nn.sigmoid(gates[:, 0 * H:1 * H])
        f = jax.nn.sigmoid(gates[:, 1 * H:2 * H])
        g = jnp.tanh(gates[:, 2 * H:3 * H])
        o = jax.nn.sigmoid(gates[:, 3 * H:4 * H])
        c_new = f * c + i * g
        h_new = o * jnp.tanh(c_new)
        return h_new, c_new

    def step(t, carry):
        h1, c1, h2, c2 = carry
        x_t = x_ref[t]                                        # (B, I)
        h1, c1 = cell(jnp.concatenate([x_t, h1], axis=1), c1, w0, b0)
        h2, c2 = cell(jnp.concatenate([h1, h2], axis=1), c2, w1, b1)
        return (h1, c1, h2, c2)

    z = jnp.zeros((B, H), jnp.float32)
    _, _, h2, _ = lax.fori_loop(0, S, step, (z, z, z, z), unroll=True)

    out_ref[...] = (jnp.dot(h2, wlin_ref[...],
                            preferred_element_type=jnp.float32)
                    + blin_ref[...])


# -----------------------------------------------------------------------------
# Wrapper: single pallas_call, no grid, all operands whole-array in VMEM.
# -----------------------------------------------------------------------------
@functools.partial(jax.jit, static_argnames=())
def lstm_forward(x, params):
    """x: (S, B, I) float32 -> (B, O) float32."""
    S, B, I = x.shape
    O = params["wlin_t"].shape[1]

    vmem = pl.BlockSpec(memory_space=pltpu.MemorySpace.VMEM)

    return pl.pallas_call(
        _lstm_kernel,
        out_shape=jax.ShapeDtypeStruct((B, O), jnp.float32),
        in_specs=[vmem] * 7,
        out_specs=vmem,
    )(x,
      params["w0"], params["b0"],
      params["w1"], params["b1"],
      params["wlin_t"], params["blin"])


# -----------------------------------------------------------------------------
# Deterministic parameter init (mimics PyTorch uniform(-1/sqrt(H), 1/sqrt(H)))
# with kernel-friendly packing: per-layer W = concat([W_ih^T, W_hh^T], axis=0),
# biases fused (b_ih + b_hh).
# -----------------------------------------------------------------------------
def init_params(key, input_size, hidden_size, output_size):
    k = 1.0 / np.sqrt(hidden_size)
    keys = jax.random.split(key, 12)

    def u(k_, shape):
        return jax.random.uniform(k_, shape, jnp.float32, -k, k)

    # raw PyTorch-layout weights
    w_ih_l0 = u(keys[0], (4 * hidden_size, input_size))
    w_hh_l0 = u(keys[1], (4 * hidden_size, hidden_size))
    b_ih_l0 = u(keys[2], (4 * hidden_size,))
    b_hh_l0 = u(keys[3], (4 * hidden_size,))
    w_ih_l1 = u(keys[4], (4 * hidden_size, hidden_size))
    w_hh_l1 = u(keys[5], (4 * hidden_size, hidden_size))
    b_ih_l1 = u(keys[6], (4 * hidden_size,))
    b_hh_l1 = u(keys[7], (4 * hidden_size,))
    w_lin = u(keys[8], (output_size, hidden_size))
    b_lin = u(keys[9], (output_size,))

    params = {
        # fused layer-0: (I+H, 4H)
        "w0": jnp.concatenate([w_ih_l0.T, w_hh_l0.T], axis=0),
        "b0": (b_ih_l0 + b_hh_l0)[None, :],            # (1, 4H)
        # fused layer-1: (2H, 4H)
        "w1": jnp.concatenate([w_ih_l1.T, w_hh_l1.T], axis=0),
        "b1": (b_ih_l1 + b_hh_l1)[None, :],            # (1, 4H)
        "wlin_t": w_lin.T,                             # (H, O)
        "blin": b_lin[None, :],                        # (1, O)
    }
    return params


# -----------------------------------------------------------------------------
# Pure-JAX reference (for silent correctness check)
# -----------------------------------------------------------------------------
def lstm_forward_ref(x, params):
    S, B, I = x.shape
    H = params["wlin_t"].shape[0]

    def cell(xh, c, w, b):
        gates = xh @ w + b
        i = jax.nn.sigmoid(gates[:, 0 * H:1 * H])
        f = jax.nn.sigmoid(gates[:, 1 * H:2 * H])
        g = jnp.tanh(gates[:, 2 * H:3 * H])
        o = jax.nn.sigmoid(gates[:, 3 * H:4 * H])
        c_new = f * c + i * g
        h_new = o * jnp.tanh(c_new)
        return h_new, c_new

    def step(carry, x_t):
        h1, c1, h2, c2 = carry
        h1, c1 = cell(jnp.concatenate([x_t, h1], axis=1), c1,
                      params["w0"], params["b0"])
        h2, c2 = cell(jnp.concatenate([h1, h2], axis=1), c2,
                      params["w1"], params["b1"])
        return (h1, c1, h2, c2), h2

    z = jnp.zeros((B, H), jnp.float32)
    (_, _, h2, _), _ = lax.scan(step, (z, z, z, z), x)
    return h2 @ params["wlin_t"] + params["blin"]


# -----------------------------------------------------------------------------
if __name__ == "__main__":
    SEQ, BATCH = 8, 2
    INPUT_SIZE, HIDDEN_SIZE, OUTPUT_SIZE = 2, 4, 1

    key = jax.random.PRNGKey(0)
    k_x, k_p = jax.random.split(key)

    x = jax.random.normal(k_x, (SEQ, BATCH, INPUT_SIZE), jnp.float32)
    params = init_params(k_p, INPUT_SIZE, HIDDEN_SIZE, OUTPUT_SIZE)

    out = lstm_forward(x, params)
    out = jax.block_until_ready(out)

    ref = lstm_forward_ref(x, params)
    np.testing.assert_allclose(np.asarray(out), np.asarray(ref),
                               rtol=1e-5, atol=1e-5)

    assert out.shape == (BATCH, OUTPUT_SIZE)
    print("KERNEL_OK")
</pallas_src>

<mosaic_0001>
module attributes {stable_mosaic.version = 11 : i64} {
  func.func @_lstm_kernel(%arg0: memref<8x2x2xf32, #tpu.memory_space<vmem>>, %arg1: memref<6x16xf32, #tpu.memory_space<vmem>>, %arg2: memref<1x16xf32, #tpu.memory_space<vmem>>, %arg3: memref<8x16xf32, #tpu.memory_space<vmem>>, %arg4: memref<1x16xf32, #tpu.memory_space<vmem>>, %arg5: memref<4x1xf32, #tpu.memory_space<vmem>>, %arg6: memref<1x1xf32, #tpu.memory_space<vmem>>, %arg7: memref<2x1xf32, #tpu.memory_space<vmem>>) attributes {dimension_semantics = [], scalar_prefetch = 0 : i64, scratch_operands = 0 : i64, tpu.core_type = #tpu.core_type<tc>} {
    %c0 = arith.constant 0 : index
    %c0_0 = arith.constant 0 : index
    %0 = vector.load %arg1[%c0, %c0_0] : memref<6x16xf32, #tpu.memory_space<vmem>>, vector<6x16xf32>
    %c0_1 = arith.constant 0 : index
    %c0_2 = arith.constant 0 : index
    %1 = vector.load %arg2[%c0_1, %c0_2] : memref<1x16xf32, #tpu.memory_space<vmem>>, vector<1x16xf32>
    %c0_3 = arith.constant 0 : index
    %c0_4 = arith.constant 0 : index
    %2 = vector.load %arg3[%c0_3, %c0_4] : memref<8x16xf32, #tpu.memory_space<vmem>>, vector<8x16xf32>
    %c0_5 = arith.constant 0 : index
    %c0_6 = arith.constant 0 : index
    %3 = vector.load %arg4[%c0_5, %c0_6] : memref<1x16xf32, #tpu.memory_space<vmem>>, vector<1x16xf32>
    %cst = arith.constant 0.000000e+00 : f32
    %4 = vector.broadcast %cst : f32 to vector<2x4xf32>
    %c0_i32 = arith.constant 0 : i32
    %5 = arith.index_cast %c0_i32 : i32 to index
    %c0_7 = arith.constant 0 : index
    %c0_8 = arith.constant 0 : index
    %6 = vector.load %arg0[%5, %c0_7, %c0_8] : memref<8x2x2xf32, #tpu.memory_space<vmem>>, vector<1x2x2xf32>
    %7 = vector.shape_cast %6 : vector<1x2x2xf32> to vector<2x2xf32>
    %8 = tpu.concatenate %7, %4 in 1 : vector<2x2xf32>, vector<2x4xf32> -> vector<2x6xf32>
    %cst_9 = arith.constant dense<0.000000e+00> : vector<2x16xf32>
    %9 = tpu.matmul %8, %0, %cst_9 {dimension_numbers = #tpu.dot_dimension_numbers<[1], [0], [0], [1], [0, 0, 1, 1], [], []>} : vector<2x6xf32>, vector<6x16xf32>, vector<2x16xf32> -> vector<2x16xf32>
    %10 = vector.broadcast %1 : vector<1x16xf32> to vector<2x16xf32>
    %11 = arith.addf %9, %10 : vector<2x16xf32>
    %12 = vector.extract_strided_slice %11 {offsets = [0, 0], sizes = [2, 4], strides = [1, 1]} : vector<2x16xf32> to vector<2x4xf32>
    %13 = arith.negf %12 : vector<2x4xf32>
    %14 = math.exp %13 : vector<2x4xf32>
    %cst_10 = arith.constant 1.000000e+00 : f32
    %15 = vector.broadcast %cst_10 : f32 to vector<2x4xf32>
    %16 = arith.addf %15, %14 : vector<2x4xf32>
    %17 = arith.divf %15, %16 : vector<2x4xf32>
    %18 = vector.extract_strided_slice %11 {offsets = [0, 4], sizes = [2, 4], strides = [1, 1]} : vector<2x16xf32> to vector<2x4xf32>
    %19 = arith.negf %18 : vector<2x4xf32>
    %20 = math.exp %19 : vector<2x4xf32>
    %cst_11 = arith.constant 1.000000e+00 : f32
    %21 = vector.broadcast %cst_11 : f32 to vector<2x4xf32>
    %22 = arith.addf %21, %20 : vector<2x4xf32>
    %23 = arith.divf %21, %22 : vector<2x4xf32>
    %24 = vector.extract_strided_slice %11 {offsets = [0, 8], sizes = [2, 4], strides = [1, 1]} : vector<2x16xf32> to vector<2x4xf32>
    %25 = math.tanh %24 : vector<2x4xf32>
    %26 = vector.extract_strided_slice %11 {offsets = [0, 12], sizes = [2, 4], strides = [1, 1]} : vector<2x16xf32> to vector<2x4xf32>
    %27 = arith.negf %26 : vector<2x4xf32>
    %28 = math.exp %27 : vector<2x4xf32>
    %cst_12 = arith.constant 1.000000e+00 : f32
    %29 = vector.broadcast %cst_12 : f32 to vector<2x4xf32>
    %30 = arith.addf %29, %28 : vector<2x4xf32>
    %31 = arith.divf %29, %30 : vector<2x4xf32>
    %32 = arith.mulf %23, %4 : vector<2x4xf32>
    %33 = arith.mulf %17, %25 : vector<2x4xf32>
    %34 = arith.addf %32, %33 : vector<2x4xf32>
    %35 = math.tanh %34 : vector<2x4xf32>
    %36 = arith.mulf %31, %35 : vector<2x4xf32>
    %37 = tpu.concatenate %36, %4 in 1 : vector<2x4xf32>, vector<2x4xf32> -> vector<2x8xf32>
    %cst_13 = arith.constant dense<0.000000e+00> : vector<2x16xf32>
    %38 = tpu.matmul %37, %2, %cst_13 {dimension_numbers = #tpu.dot_dimension_numbers<[1], [0], [0], [1], [0, 0, 1, 1], [], []>} : vector<2x8xf32>, vector<8x16xf32>, vector<2x16xf32> -> vector<2x16xf32>
    %39 = vector.broadcast %3 : vector<1x16xf32> to vector<2x16xf32>
    %40 = arith.addf %38, %39 : vector<2x16xf32>
    %41 = vector.extract_strided_slice %40 {offsets = [0, 0], sizes = [2, 4], strides = [1, 1]} : vector<2x16xf32> to vector<2x4xf32>
    %42 = arith.negf %41 : vector<2x4xf32>
    %43 = math.exp %42 : vector<2x4xf32>
    %cst_14 = arith.constant 1.000000e+00 : f32
    %44 = vector.broadcast %cst_14 : f32 to vector<2x4xf32>
    %45 = arith.addf %44, %43 : vector<2x4xf32>
    %46 = arith.divf %44, %45 : vector<2x4xf32>
    %47 = vector.extract_strided_slice %40 {offsets = [0, 4], sizes = [2, 4], strides = [1, 1]} : vector<2x16xf32> to vector<2x4xf32>
    %48 = arith.negf %47 : vector<2x4xf32>
    %49 = math.exp %48 : vector<2x4xf32>
    %cst_15 = arith.constant 1.000000e+00 : f32
    %50 = vector.broadcast %cst_15 : f32 to vector<2x4xf32>
    %51 = arith.addf %50, %49 : vector<2x4xf32>
    %52 = arith.divf %50, %51 : vector<2x4xf32>
    %53 = vector.extract_strided_slice %40 {offsets = [0, 8], sizes = [2, 4], strides = [1, 1]} : vector<2x16xf32> to vector<2x4xf32>
    %54 = math.tanh %53 : vector<2x4xf32>
    %55 = vector.extract_strided_slice %40 {offsets = [0, 12], sizes = [2, 4], strides = [1, 1]} : vector<2x16xf32> to vector<2x4xf32>
    %56 = arith.negf %55 : vector<2x4xf32>
    %57 = math.exp %56 : vector<2x4xf32>
    %cst_16 = arith.constant 1.000000e+00 : f32
    %58 = vector.broadcast %cst_16 : f32 to vector<2x4xf32>
    %59 = arith.addf %58, %57 : vector<2x4xf32>
    %60 = arith.divf %58, %59 : vector<2x4xf32>
    %61 = arith.mulf %52, %4 : vector<2x4xf32>
    %62 = arith.mulf %46, %54 : vector<2x4xf32>
    %63 = arith.addf %61, %62 : vector<2x4xf32>
    %64 = math.tanh %63 : vector<2x4xf32>
    %65 = arith.mulf %60, %64 : vector<2x4xf32>
    %c1_i32 = arith.constant 1 : i32
    %66 = arith.index_cast %c1_i32 : i32 to index
    %c0_17 = arith.constant 0 : index
    %c0_18 = arith.constant 0 : index
    %67 = vector.load %arg0[%66, %c0_17, %c0_18] : memref<8x2x2xf32, #tpu.memory_space<vmem>>, vector<1x2x2xf32>
    %68 = vector.shape_cast %67 : vector<1x2x2xf32> to vector<2x2xf32>
    %69 = tpu.concatenate %68, %36 in 1 : vector<2x2xf32>, vector<2x4xf32> -> vector<2x6xf32>
    %cst_19 = arith.constant dense<0.000000e+00> : vector<2x16xf32>
    %70 = tpu.matmul %69, %0, %cst_19 {dimension_numbers = #tpu.dot_dimension_numbers<[1], [0], [0], [1], [0, 0, 1, 1], [], []>} : vector<2x6xf32>, vector<6x16xf32>, vector<2x16xf32> -> vector<2x16xf32>
    %71 = vector.broadcast %1 : vector<1x16xf32> to vector<2x16xf32>
    %72 = arith.addf %70, %71 : vector<2x16xf32>
    %73 = vector.extract_strided_slice %72 {offsets = [0, 0], sizes = [2, 4], strides = [1, 1]} : vector<2x16xf32> to vector<2x4xf32>
    %74 = arith.negf %73 : vector<2x4xf32>
    %75 = math.exp %74 : vector<2x4xf32>
    %cst_20 = arith.constant 1.000000e+00 : f32
    %76 = vector.broadcast %cst_20 : f32 to vector<2x4xf32>
    %77 = arith.addf %76, %75 : vector<2x4xf32>
    %78 = arith.divf %76, %77 : vector<2x4xf32>
    %79 = vector.extract_strided_slice %72 {offsets = [0, 4], sizes = [2, 4], strides = [1, 1]} : vector<2x16xf32> to vector<2x4xf32>
    %80 = arith.negf %79 : vector<2x4xf32>
    %81 = math.exp %80 : vector<2x4xf32>
    %cst_21 = arith.constant 1.000000e+00 : f32
    %82 = vector.broadcast %cst_21 : f32 to vector<2x4xf32>
    %83 = arith.addf %82, %81 : vector<2x4xf32>
    %84 = arith.divf %82, %83 : vector<2x4xf32>
    %85 = vector.extract_strided_slice %72 {offsets = [0, 8], sizes = [2, 4], strides = [1, 1]} : vector<2x16xf32> to vector<2x4xf32>
    %86 = math.tanh %85 : vector<2x4xf32>
    %87 = vector.extract_strided_slice %72 {offsets = [0, 12], sizes = [2, 4], strides = [1, 1]} : vector<2x16xf32> to vector<2x4xf32>
    %88 = arith.negf %87 : vector<2x4xf32>
    %89 = math.exp %88 : vector<2x4xf32>
    %cst_22 = arith.constant 1.000000e+00 : f32
    %90 = vector.broadcast %cst_22 : f32 to vector<2x4xf32>
    %91 = arith.addf %90, %89 : vector<2x4xf32>
    %92 = arith.divf %90, %91 : vector<2x4xf32>
    %93 = arith.mulf %84, %34 : vector<2x4xf32>
    %94 = arith.mulf %78, %86 : vector<2x4xf32>
    %95 = arith.addf %93, %94 : vector<2x4xf32>
    %96 = math.tanh %95 : vector<2x4xf32>
    %97 = arith.mulf %92, %96 : vector<2x4xf32>
    %98 = tpu.concatenate %97, %65 in 1 : vector<2x4xf32>, vector<2x4xf32> -> vector<2x8xf32>
    %cst_23 = arith.constant dense<0.000000e+00> : vector<2x16xf32>
    %99 = tpu.matmul %98, %2, %cst_23 {dimension_numbers = #tpu.dot_dimension_numbers<[1], [0], [0], [1], [0, 0, 1, 1], [], []>} : vector<2x8xf32>, vector<8x16xf32>, vector<2x16xf32> -> vector<2x16xf32>
    %100 = vector.broadcast %3 : vector<1x16xf32> to vector<2x16xf32>
    %101 = arith.addf %99, %100 : vector<2x16xf32>
    %102 = vector.extract_strided_slice %101 {offsets = [0, 0], sizes = [2, 4], strides = [1, 1]} : vector<2x16xf32> to vector<2x4xf32>
    %103 = arith.negf %102 : vector<2x4xf32>
    %104 = math.exp %103 : vector<2x4xf32>
    %cst_24 = arith.constant 1.000000e+00 : f32
    %105 = vector.broadcast %cst_24 : f32 to vector<2x4xf32>
    %106 = arith.addf %105, %104 : vector<2x4xf32>
    %107 = arith.divf %105, %106 : vector<2x4xf32>
    %108 = vector.extract_strided_slice %101 {offsets = [0, 4], sizes = [2, 4], strides = [1, 1]} : vector<2x16xf32> to vector<2x4xf32>
    %109 = arith.negf %108 : vector<2x4xf32>
    %110 = math.exp %109 : vector<2x4xf32>
    %cst_25 = arith.constant 1.000000e+00 : f32
    %111 = vector.broadcast %cst_25 : f32 to vector<2x4xf32>
    %112 = arith.addf %111, %110 : vector<2x4xf32>
    %113 = arith.divf %111, %112 : vector<2x4xf32>
    %114 = vector.extract_strided_slice %101 {offsets = [0, 8], sizes = [2, 4], strides = [1, 1]} : vector<2x16xf32> to vector<2x4xf32>
    %115 = math.tanh %114 : vector<2x4xf32>
    %116 = vector.extract_strided_slice %101 {offsets = [0, 12], sizes = [2, 4], strides = [1, 1]} : vector<2x16xf32> to vector<2x4xf32>
    %117 = arith.negf %116 : vector<2x4xf32>
    %118 = math.exp %117 : vector<2x4xf32>
    %cst_26 = arith.constant 1.000000e+00 : f32
    %119 = vector.broadcast %cst_26 : f32 to vector<2x4xf32>
    %120 = arith.addf %119, %118 : vector<2x4xf32>
    %121 = arith.divf %119, %120 : vector<2x4xf32>
    %122 = arith.mulf %113, %63 : vector<2x4xf32>
    %123 = arith.mulf %107, %115 : vector<2x4xf32>
    %124 = arith.addf %122, %123 : vector<2x4xf32>
    %125 = math.tanh %124 : vector<2x4xf32>
    %126 = arith.mulf %121, %125 : vector<2x4xf32>
    %c2_i32 = arith.constant 2 : i32
    %127 = arith.index_cast %c2_i32 : i32 to index
    %c0_27 = arith.constant 0 : index
    %c0_28 = arith.constant 0 : index
    %128 = vector.load %arg0[%127, %c0_27, %c0_28] : memref<8x2x2xf32, #tpu.memory_space<vmem>>, vector<1x2x2xf32>
    %129 = vector.shape_cast %128 : vector<1x2x2xf32> to vector<2x2xf32>
    %130 = tpu.concatenate %129, %97 in 1 : vector<2x2xf32>, vector<2x4xf32> -> vector<2x6xf32>
    %cst_29 = arith.constant dense<0.000000e+00> : vector<2x16xf32>
    %131 = tpu.matmul %130, %0, %cst_29 {dimension_numbers = #tpu.dot_dimension_numbers<[1], [0], [0], [1], [0, 0, 1, 1], [], []>} : vector<2x6xf32>, vector<6x16xf32>, vector<2x16xf32> -> vector<2x16xf32>
    %132 = vector.broadcast %1 : vector<1x16xf32> to vector<2x16xf32>
    %133 = arith.addf %131, %132 : vector<2x16xf32>
    %134 = vector.extract_strided_slice %133 {offsets = [0, 0], sizes = [2, 4], strides = [1, 1]} : vector<2x16xf32> to vector<2x4xf32>
    %135 = arith.negf %134 : vector<2x4xf32>
    %136 = math.exp %135 : vector<2x4xf32>
    %cst_30 = arith.constant 1.000000e+00 : f32
    %137 = vector.broadcast %cst_30 : f32 to vector<2x4xf32>
    %138 = arith.addf %137, %136 : vector<2x4xf32>
    %139 = arith.divf %137, %138 : vector<2x4xf32>
    %140 = vector.extract_strided_slice %133 {offsets = [0, 4], sizes = [2, 4], strides = [1, 1]} : vector<2x16xf32> to vector<2x4xf32>
    %141 = arith.negf %140 : vector<2x4xf32>
    %142 = math.exp %141 : vector<2x4xf32>
    %cst_31 = arith.constant 1.000000e+00 : f32
    %143 = vector.broadcast %cst_31 : f32 to vector<2x4xf32>
    %144 = arith.addf %143, %142 : vector<2x4xf32>
    %145 = arith.divf %143, %144 : vector<2x4xf32>
    %146 = vector.extract_strided_slice %133 {offsets = [0, 8], sizes = [2, 4], strides = [1, 1]} : vector<2x16xf32> to vector<2x4xf32>
    %147 = math.tanh %146 : vector<2x4xf32>
    %148 = vector.extract_strided_slice %133 {offsets = [0, 12], sizes = [2, 4], strides = [1, 1]} : vector<2x16xf32> to vector<2x4xf32>
    %149 = arith.negf %148 : vector<2x4xf32>
    %150 = math.exp %149 : vector<2x4xf32>
    %cst_32 = arith.constant 1.000000e+00 : f32
    %151 = vector.broadcast %cst_32 : f32 to vector<2x4xf32>
    %152 = arith.addf %151, %150 : vector<2x4xf32>
    %153 = arith.divf %151, %152 : vector<2x4xf32>
    %154 = arith.mulf %145, %95 : vector<2x4xf32>
    %155 = arith.mulf %139, %147 : vector<2x4xf32>
    %156 = arith.addf %154, %155 : vector<2x4xf32>
    %157 = math.tanh %156 : vector<2x4xf32>
    %158 = arith.mulf %153, %157 : vector<2x4xf32>
    %159 = tpu.concatenate %158, %126 in 1 : vector<2x4xf32>, vector<2x4xf32> -> vector<2x8xf32>
    %cst_33 = arith.constant dense<0.000000e+00> : vector<2x16xf32>
    %160 = tpu.matmul %159, %2, %cst_33 {dimension_numbers = #tpu.dot_dimension_numbers<[1], [0], [0], [1], [0, 0, 1, 1], [], []>} : vector<2x8xf32>, vector<8x16xf32>, vector<2x16xf32> -> vector<2x16xf32>
    %161 = vector.broadcast %3 : vector<1x16xf32> to vector<2x16xf32>
    %162 = arith.addf %160, %161 : vector<2x16xf32>
    %163 = vector.extract_strided_slice %162 {offsets = [0, 0], sizes = [2, 4], strides = [1, 1]} : vector<2x16xf32> to vector<2x4xf32>
    %164 = arith.negf %163 : vector<2x4xf32>
    %165 = math.exp %164 : vector<2x4xf32>
    %cst_34 = arith.constant 1.000000e+00 : f32
    %166 = vector.broadcast %cst_34 : f32 to vector<2x4xf32>
    %167 = arith.addf %166, %165 : vector<2x4xf32>
    %168 = arith.divf %166, %167 : vector<2x4xf32>
    %169 = vector.extract_strided_slice %162 {offsets = [0, 4], sizes = [2, 4], strides = [1, 1]} : vector<2x16xf32> to vector<2x4xf32>
    %170 = arith.negf %169 : vector<2x4xf32>
    %171 = math.exp %170 : vector<2x4xf32>
    %cst_35 = arith.constant 1.000000e+00 : f32
    %172 = vector.broadcast %cst_35 : f32 to vector<2x4xf32>
    %173 = arith.addf %172, %171 : vector<2x4xf32>
    %174 = arith.divf %172, %173 : vector<2x4xf32>
    %175 = vector.extract_strided_slice %162 {offsets = [0, 8], sizes = [2, 4], strides = [1, 1]} : vector<2x16xf32> to vector<2x4xf32>
    %176 = math.tanh %175 : vector<2x4xf32>
    %177 = vector.extract_strided_slice %162 {offsets = [0, 12], sizes = [2, 4], strides = [1, 1]} : vector<2x16xf32> to vector<2x4xf32>
    %178 = arith.negf %177 : vector<2x4xf32>
    %179 = math.exp %178 : vector<2x4xf32>
    %cst_36 = arith.constant 1.000000e+00 : f32
    %180 = vector.broadcast %cst_36 : f32 to vector<2x4xf32>
    %181 = arith.addf %180, %179 : vector<2x4xf32>
    %182 = arith.divf %180, %181 : vector<2x4xf32>
    %183 = arith.mulf %174, %124 : vector<2x4xf32>
    %184 = arith.mulf %168, %176 : vector<2x4xf32>
    %185 = arith.addf %183, %184 : vector<2x4xf32>
    %186 = math.tanh %185 : vector<2x4xf32>
    %187 = arith.mulf %182, %186 : vector<2x4xf32>
    %c3_i32 = arith.constant 3 : i32
    %188 = arith.index_cast %c3_i32 : i32 to index
    %c0_37 = arith.constant 0 : index
    %c0_38 = arith.constant 0 : index
    %189 = vector.load %arg0[%188, %c0_37, %c0_38] : memref<8x2x2xf32, #tpu.memory_space<vmem>>, vector<1x2x2xf32>
    %190 = vector.shape_cast %189 : vector<1x2x2xf32> to vector<2x2xf32>
    %191 = tpu.concatenate %190, %158 in 1 : vector<2x2xf32>, vector<2x4xf32> -> vector<2x6xf32>
    %cst_39 = arith.constant dense<0.000000e+00> : vector<2x16xf32>
    %192 = tpu.matmul %191, %0, %cst_39 {dimension_numbers = #tpu.dot_dimension_numbers<[1], [0], [0], [1], [0, 0, 1, 1], [], []>} : vector<2x6xf32>, vector<6x16xf32>, vector<2x16xf32> -> vector<2x16xf32>
    %193 = vector.broadcast %1 : vector<1x16xf32> to vector<2x16xf32>
    %194 = arith.addf %192, %193 : vector<2x16xf32>
    %195 = vector.extract_strided_slice %194 {offsets = [0, 0], sizes = [2, 4], strides = [1, 1]} : vector<2x16xf32> to vector<2x4xf32>
    %196 = arith.negf %195 : vector<2x4xf32>
    %197 = math.exp %196 : vector<2x4xf32>
    %cst_40 = arith.constant 1.000000e+00 : f32
    %198 = vector.broadcast %cst_40 : f32 to vector<2x4xf32>
    %199 = arith.addf %198, %197 : vector<2x4xf32>
    %200 = arith.divf %198, %199 : vector<2x4xf32>
    %201 = vector.extract_strided_slice %194 {offsets = [0, 4], sizes = [2, 4], strides = [1, 1]} : vector<2x16xf32> to vector<2x4xf32>
    %202 = arith.negf %201 : vector<2x4xf32>
    %203 = math.exp %202 : vector<2x4xf32>
    %cst_41 = arith.constant 1.000000e+00 : f32
    %204 = vector.broadcast %cst_41 : f32 to vector<2x4xf32>
    %205 = arith.addf %204, %203 : vector<2x4xf32>
    %206 = arith.divf %204, %205 : vector<2x4xf32>
    %207 = vector.extract_strided_slice %194 {offsets = [0, 8], sizes = [2, 4], strides = [1, 1]} : vector<2x16xf32> to vector<2x4xf32>
    %208 = math.tanh %207 : vector<2x4xf32>
    %209 = vector.extract_strided_slice %194 {offsets = [0, 12], sizes = [2, 4], strides = [1, 1]} : vector<2x16xf32> to vector<2x4xf32>
    %210 = arith.negf %209 : vector<2x4xf32>
    %211 = math.exp %210 : vector<2x4xf32>
    %cst_42 = arith.constant 1.000000e+00 : f32
    %212 = vector.broadcast %cst_42 : f32 to vector<2x4xf32>
    %213 = arith.addf %212, %211 : vector<2x4xf32>
    %214 = arith.divf %212, %213 : vector<2x4xf32>
    %215 = arith.mulf %206, %156 : vector<2x4xf32>
    %216 = arith.mulf %200, %208 : vector<2x4xf32>
    %217 = arith.addf %215, %216 : vector<2x4xf32>
    %218 = math.tanh %217 : vector<2x4xf32>
    %219 = arith.mulf %214, %218 : vector<2x4xf32>
    %220 = tpu.concatenate %219, %187 in 1 : vector<2x4xf32>, vector<2x4xf32> -> vector<2x8xf32>
    %cst_43 = arith.constant dense<0.000000e+00> : vector<2x16xf32>
    %221 = tpu.matmul %220, %2, %cst_43 {dimension_numbers = #tpu.dot_dimension_numbers<[1], [0], [0], [1], [0, 0, 1, 1], [], []>} : vector<2x8xf32>, vector<8x16xf32>, vector<2x16xf32> -> vector<2x16xf32>
    %222 = vector.broadcast %3 : vector<1x16xf32> to vector<2x16xf32>
    %223 = arith.addf %221, %222 : vector<2x16xf32>
    %224 = vector.extract_strided_slice %223 {offsets = [0, 0], sizes = [2, 4], strides = [1, 1]} : vector<2x16xf32> to vector<2x4xf32>
    %225 = arith.negf %224 : vector<2x4xf32>
    %226 = math.exp %225 : vector<2x4xf32>
    %cst_44 = arith.constant 1.000000e+00 : f32
    %227 = vector.broadcast %cst_44 : f32 to vector<2x4xf32>
    %228 = arith.addf %227, %226 : vector<2x4xf32>
    %229 = arith.divf %227, %228 : vector<2x4xf32>
    %230 = vector.extract_strided_slice %223 {offsets = [0, 4], sizes = [2, 4], strides = [1, 1]} : vector<2x16xf32> to vector<2x4xf32>
    %231 = arith.negf %230 : vector<2x4xf32>
    %232 = math.exp %231 : vector<2x4xf32>
    %cst_45 = arith.constant 1.000000e+00 : f32
    %233 = vector.broadcast %cst_45 : f32 to vector<2x4xf32>
    %234 = arith.addf %233, %232 : vector<2x4xf32>
    %235 = arith.divf %233, %234 : vector<2x4xf32>
    %236 = vector.extract_strided_slice %223 {offsets = [0, 8], sizes = [2, 4], strides = [1, 1]} : vector<2x16xf32> to vector<2x4xf32>
    %237 = math.tanh %236 : vector<2x4xf32>
    %238 = vector.extract_strided_slice %223 {offsets = [0, 12], sizes = [2, 4], strides = [1, 1]} : vector<2x16xf32> to vector<2x4xf32>
    %239 = arith.negf %238 : vector<2x4xf32>
    %240 = math.exp %239 : vector<2x4xf32>
    %cst_46 = arith.constant 1.000000e+00 : f32
    %241 = vector.broadcast %cst_46 : f32 to vector<2x4xf32>
    %242 = arith.addf %241, %240 : vector<2x4xf32>
    %243 = arith.divf %241, %242 : vector<2x4xf32>
    %244 = arith.mulf %235, %185 : vector<2x4xf32>
    %245 = arith.mulf %229, %237 : vector<2x4xf32>
    %246 = arith.addf %244, %245 : vector<2x4xf32>
    %247 = math.tanh %246 : vector<2x4xf32>
    %248 = arith.mulf %243, %247 : vector<2x4xf32>
    %c4_i32 = arith.constant 4 : i32
    %249 = arith.index_cast %c4_i32 : i32 to index
    %c0_47 = arith.constant 0 : index
    %c0_48 = arith.constant 0 : index
    %250 = vector.load %arg0[%249, %c0_47, %c0_48] : memref<8x2x2xf32, #tpu.memory_space<vmem>>, vector<1x2x2xf32>
    %251 = vector.shape_cast %250 : vector<1x2x2xf32> to vector<2x2xf32>
    %252 = tpu.concatenate %251, %219 in 1 : vector<2x2xf32>, vector<2x4xf32> -> vector<2x6xf32>
    %cst_49 = arith.constant dense<0.000000e+00> : vector<2x16xf32>
    %253 = tpu.matmul %252, %0, %cst_49 {dimension_numbers = #tpu.dot_dimension_numbers<[1], [0], [0], [1], [0, 0, 1, 1], [], []>} : vector<2x6xf32>, vector<6x16xf32>, vector<2x16xf32> -> vector<2x16xf32>
    %254 = vector.broadcast %1 : vector<1x16xf32> to vector<2x16xf32>
    %255 = arith.addf %253, %254 : vector<2x16xf32>
    %256 = vector.extract_strided_slice %255 {offsets = [0, 0], sizes = [2, 4], strides = [1, 1]} : vector<2x16xf32> to vector<2x4xf32>
    %257 = arith.negf %256 : vector<2x4xf32>
    %258 = math.exp %257 : vector<2x4xf32>
    %cst_50 = arith.constant 1.000000e+00 : f32
    %259 = vector.broadcast %cst_50 : f32 to vector<2x4xf32>
    %260 = arith.addf %259, %258 : vector<2x4xf32>
    %261 = arith.divf %259, %260 : vector<2x4xf32>
    %262 = vector.extract_strided_slice %255 {offsets = [0, 4], sizes = [2, 4], strides = [1, 1]} : vector<2x16xf32> to vector<2x4xf32>
    %263 = arith.negf %262 : vector<2x4xf32>
    %264 = math.exp %263 : vector<2x4xf32>
    %cst_51 = arith.constant 1.000000e+00 : f32
    %265 = vector.broadcast %cst_51 : f32 to vector<2x4xf32>
    %266 = arith.addf %265, %264 : vector<2x4xf32>
    %267 = arith.divf %265, %266 : vector<2x4xf32>
    %268 = vector.extract_strided_slice %255 {offsets = [0, 8], sizes = [2, 4], strides = [1, 1]} : vector<2x16xf32> to vector<2x4xf32>
    %269 = math.tanh %268 : vector<2x4xf32>
    %270 = vector.extract_strided_slice %255 {offsets = [0, 12], sizes = [2, 4], strides = [1, 1]} : vector<2x16xf32> to vector<2x4xf32>
    %271 = arith.negf %270 : vector<2x4xf32>
    %272 = math.exp %271 : vector<2x4xf32>
    %cst_52 = arith.constant 1.000000e+00 : f32
    %273 = vector.broadcast %cst_52 : f32 to vector<2x4xf32>
    %274 = arith.addf %273, %272 : vector<2x4xf32>
    %275 = arith.divf %273, %274 : vector<2x4xf32>
    %276 = arith.mulf %267, %217 : vector<2x4xf32>
    %277 = arith.mulf %261, %269 : vector<2x4xf32>
    %278 = arith.addf %276, %277 : vector<2x4xf32>
    %279 = math.tanh %278 : vector<2x4xf32>
    %280 = arith.mulf %275, %279 : vector<2x4xf32>
    %281 = tpu.concatenate %280, %248 in 1 : vector<2x4xf32>, vector<2x4xf32> -> vector<2x8xf32>
    %cst_53 = arith.constant dense<0.000000e+00> : vector<2x16xf32>
    %282 = tpu.matmul %281, %2, %cst_53 {dimension_numbers = #tpu.dot_dimension_numbers<[1], [0], [0], [1], [0, 0, 1, 1], [], []>} : vector<2x8xf32>, vector<8x16xf32>, vector<2x16xf32> -> vector<2x16xf32>
    %283 = vector.broadcast %3 : vector<1x16xf32> to vector<2x16xf32>
    %284 = arith.addf %282, %283 : vector<2x16xf32>
    %285 = vector.extract_strided_slice %284 {offsets = [0, 0], sizes = [2, 4], strides = [1, 1]} : vector<2x16xf32> to vector<2x4xf32>
    %286 = arith.negf %285 : vector<2x4xf32>
    %287 = math.exp %286 : vector<2x4xf32>
    %cst_54 = arith.constant 1.000000e+00 : f32
    %288 = vector.broadcast %cst_54 : f32 to vector<2x4xf32>
    %289 = arith.addf %288, %287 : vector<2x4xf32>
    %290 = arith.divf %288, %289 : vector<2x4xf32>
    %291 = vector.extract_strided_slice %284 {offsets = [0, 4], sizes = [2, 4], strides = [1, 1]} : vector<2x16xf32> to vector<2x4xf32>
    %292 = arith.negf %291 : vector<2x4xf32>
    %293 = math.exp %292 : vector<2x4xf32>
    %cst_55 = arith.constant 1.000000e+00 : f32
    %294 = vector.broadcast %cst_55 : f32 to vector<2x4xf32>
    %295 = arith.addf %294, %293 : vector<2x4xf32>
    %296 = arith.divf %294, %295 : vector<2x4xf32>
    %297 = vector.extract_strided_slice %284 {offsets = [0, 8], sizes = [2, 4], strides = [1, 1]} : vector<2x16xf32> to vector<2x4xf32>
    %298 = math.tanh %297 : vector<2x4xf32>
    %299 = vector.extract_strided_slice %284 {offsets = [0, 12], sizes = [2, 4], strides = [1, 1]} : vector<2x16xf32> to vector<2x4xf32>
    %300 = arith.negf %299 : vector<2x4xf32>
    %301 = math.exp %300 : vector<2x4xf32>
    %cst_56 = arith.constant 1.000000e+00 : f32
    %302 = vector.broadcast %cst_56 : f32 to vector<2x4xf32>
    %303 = arith.addf %302, %301 : vector<2x4xf32>
    %304 = arith.divf %302, %303 : vector<2x4xf32>
    %305 = arith.mulf %296, %246 : vector<2x4xf32>
    %306 = arith.mulf %290, %298 : vector<2x4xf32>
    %307 = arith.addf %305, %306 : vector<2x4xf32>
    %308 = math.tanh %307 : vector<2x4xf32>
    %309 = arith.mulf %304, %308 : vector<2x4xf32>
    %c5_i32 = arith.constant 5 : i32
    %310 = arith.index_cast %c5_i32 : i32 to index
    %c0_57 = arith.constant 0 : index
    %c0_58 = arith.constant 0 : index
    %311 = vector.load %arg0[%310, %c0_57, %c0_58] : memref<8x2x2xf32, #tpu.memory_space<vmem>>, vector<1x2x2xf32>
    %312 = vector.shape_cast %311 : vector<1x2x2xf32> to vector<2x2xf32>
    %313 = tpu.concatenate %312, %280 in 1 : vector<2x2xf32>, vector<2x4xf32> -> vector<2x6xf32>
    %cst_59 = arith.constant dense<0.000000e+00> : vector<2x16xf32>
    %314 = tpu.matmul %313, %0, %cst_59 {dimension_numbers = #tpu.dot_dimension_numbers<[1], [0], [0], [1], [0, 0, 1, 1], [], []>} : vector<2x6xf32>, vector<6x16xf32>, vector<2x16xf32> -> vector<2x16xf32>
    %315 = vector.broadcast %1 : vector<1x16xf32> to vector<2x16xf32>
    %316 = arith.addf %314, %315 : vector<2x16xf32>
    %317 = vector.extract_strided_slice %316 {offsets = [0, 0], sizes = [2, 4], strides = [1, 1]} : vector<2x16xf32> to vector<2x4xf32>
    %318 = arith.negf %317 : vector<2x4xf32>
    %319 = math.exp %318 : vector<2x4xf32>
    %cst_60 = arith.constant 1.000000e+00 : f32
    %320 = vector.broadcast %cst_60 : f32 to vector<2x4xf32>
    %321 = arith.addf %320, %319 : vector<2x4xf32>
    %322 = arith.divf %320, %321 : vector<2x4xf32>
    %323 = vector.extract_strided_slice %316 {offsets = [0, 4], sizes = [2, 4], strides = [1, 1]} : vector<2x16xf32> to vector<2x4xf32>
    %324 = arith.negf %323 : vector<2x4xf32>
    %325 = math.exp %324 : vector<2x4xf32>
    %cst_61 = arith.constant 1.000000e+00 : f32
    %326 = vector.broadcast %cst_61 : f32 to vector<2x4xf32>
    %327 = arith.addf %326, %325 : vector<2x4xf32>
    %328 = arith.divf %326, %327 : vector<2x4xf32>
    %329 = vector.extract_strided_slice %316 {offsets = [0, 8], sizes = [2, 4], strides = [1, 1]} : vector<2x16xf32> to vector<2x4xf32>
    %330 = math.tanh %329 : vector<2x4xf32>
    %331 = vector.extract_strided_slice %316 {offsets = [0, 12], sizes = [2, 4], strides = [1, 1]} : vector<2x16xf32> to vector<2x4xf32>
    %332 = arith.negf %331 : vector<2x4xf32>
    %333 = math.exp %332 : vector<2x4xf32>
    %cst_62 = arith.constant 1.000000e+00 : f32
    %334 = vector.broadcast %cst_62 : f32 to vector<2x4xf32>
    %335 = arith.addf %334, %333 : vector<2x4xf32>
    %336 = arith.divf %334, %335 : vector<2x4xf32>
    %337 = arith.mulf %328, %278 : vector<2x4xf32>
    %338 = arith.mulf %322, %330 : vector<2x4xf32>
    %339 = arith.addf %337, %338 : vector<2x4xf32>
    %340 = math.tanh %339 : vector<2x4xf32>
    %341 = arith.mulf %336, %340 : vector<2x4xf32>
    %342 = tpu.concatenate %341, %309 in 1 : vector<2x4xf32>, vector<2x4xf32> -> vector<2x8xf32>
    %cst_63 = arith.constant dense<0.000000e+00> : vector<2x16xf32>
    %343 = tpu.matmul %342, %2, %cst_63 {dimension_numbers = #tpu.dot_dimension_numbers<[1], [0], [0], [1], [0, 0, 1, 1], [], []>} : vector<2x8xf32>, vector<8x16xf32>, vector<2x16xf32> -> vector<2x16xf32>
    %344 = vector.broadcast %3 : vector<1x16xf32> to vector<2x16xf32>
    %345 = arith.addf %343, %344 : vector<2x16xf32>
    %346 = vector.extract_strided_slice %345 {offsets = [0, 0], sizes = [2, 4], strides = [1, 1]} : vector<2x16xf32> to vector<2x4xf32>
    %347 = arith.negf %346 : vector<2x4xf32>
    %348 = math.exp %347 : vector<2x4xf32>
    %cst_64 = arith.constant 1.000000e+00 : f32
    %349 = vector.broadcast %cst_64 : f32 to vector<2x4xf32>
    %350 = arith.addf %349, %348 : vector<2x4xf32>
    %351 = arith.divf %349, %350 : vector<2x4xf32>
    %352 = vector.extract_strided_slice %345 {offsets = [0, 4], sizes = [2, 4], strides = [1, 1]} : vector<2x16xf32> to vector<2x4xf32>
    %353 = arith.negf %352 : vector<2x4xf32>
    %354 = math.exp %353 : vector<2x4xf32>
    %cst_65 = arith.constant 1.000000e+00 : f32
    %355 = vector.broadcast %cst_65 : f32 to vector<2x4xf32>
    %356 = arith.addf %355, %354 : vector<2x4xf32>
    %357 = arith.divf %355, %356 : vector<2x4xf32>
    %358 = vector.extract_strided_slice %345 {offsets = [0, 8], sizes = [2, 4], strides = [1, 1]} : vector<2x16xf32> to vector<2x4xf32>
    %359 = math.tanh %358 : vector<2x4xf32>
    %360 = vector.extract_strided_slice %345 {offsets = [0, 12], sizes = [2, 4], strides = [1, 1]} : vector<2x16xf32> to vector<2x4xf32>
    %361 = arith.negf %360 : vector<2x4xf32>
    %362 = math.exp %361 : vector<2x4xf32>
    %cst_66 = arith.constant 1.000000e+00 : f32
    %363 = vector.broadcast %cst_66 : f32 to vector<2x4xf32>
    %364 = arith.addf %363, %362 : vector<2x4xf32>
    %365 = arith.divf %363, %364 : vector<2x4xf32>
    %366 = arith.mulf %357, %307 : vector<2x4xf32>
    %367 = arith.mulf %351, %359 : vector<2x4xf32>
    %368 = arith.addf %366, %367 : vector<2x4xf32>
    %369 = math.tanh %368 : vector<2x4xf32>
    %370 = arith.mulf %365, %369 : vector<2x4xf32>
    %c6_i32 = arith.constant 6 : i32
    %371 = arith.index_cast %c6_i32 : i32 to index
    %c0_67 = arith.constant 0 : index
    %c0_68 = arith.constant 0 : index
    %372 = vector.load %arg0[%371, %c0_67, %c0_68] : memref<8x2x2xf32, #tpu.memory_space<vmem>>, vector<1x2x2xf32>
    %373 = vector.shape_cast %372 : vector<1x2x2xf32> to vector<2x2xf32>
    %374 = tpu.concatenate %373, %341 in 1 : vector<2x2xf32>, vector<2x4xf32> -> vector<2x6xf32>
    %cst_69 = arith.constant dense<0.000000e+00> : vector<2x16xf32>
    %375 = tpu.matmul %374, %0, %cst_69 {dimension_numbers = #tpu.dot_dimension_numbers<[1], [0], [0], [1], [0, 0, 1, 1], [], []>} : vector<2x6xf32>, vector<6x16xf32>, vector<2x16xf32> -> vector<2x16xf32>
    %376 = vector.broadcast %1 : vector<1x16xf32> to vector<2x16xf32>
    %377 = arith.addf %375, %376 : vector<2x16xf32>
    %378 = vector.extract_strided_slice %377 {offsets = [0, 0], sizes = [2, 4], strides = [1, 1]} : vector<2x16xf32> to vector<2x4xf32>
    %379 = arith.negf %378 : vector<2x4xf32>
    %380 = math.exp %379 : vector<2x4xf32>
    %cst_70 = arith.constant 1.000000e+00 : f32
    %381 = vector.broadcast %cst_70 : f32 to vector<2x4xf32>
    %382 = arith.addf %381, %380 : vector<2x4xf32>
    %383 = arith.divf %381, %382 : vector<2x4xf32>
    %384 = vector.extract_strided_slice %377 {offsets = [0, 4], sizes = [2, 4], strides = [1, 1]} : vector<2x16xf32> to vector<2x4xf32>
    %385 = arith.negf %384 : vector<2x4xf32>
    %386 = math.exp %385 : vector<2x4xf32>
    %cst_71 = arith.constant 1.000000e+00 : f32
    %387 = vector.broadcast %cst_71 : f32 to vector<2x4xf32>
    %388 = arith.addf %387, %386 : vector<2x4xf32>
    %389 = arith.divf %387, %388 : vector<2x4xf32>
    %390 = vector.extract_strided_slice %377 {offsets = [0, 8], sizes = [2, 4], strides = [1, 1]} : vector<2x16xf32> to vector<2x4xf32>
    %391 = math.tanh %390 : vector<2x4xf32>
    %392 = vector.extract_strided_slice %377 {offsets = [0, 12], sizes = [2, 4], strides = [1, 1]} : vector<2x16xf32> to vector<2x4xf32>
    %393 = arith.negf %392 : vector<2x4xf32>
    %394 = math.exp %393 : vector<2x4xf32>
    %cst_72 = arith.constant 1.000000e+00 : f32
    %395 = vector.broadcast %cst_72 : f32 to vector<2x4xf32>
    %396 = arith.addf %395, %394 : vector<2x4xf32>
    %397 = arith.divf %395, %396 : vector<2x4xf32>
    %398 = arith.mulf %389, %339 : vector<2x4xf32>
    %399 = arith.mulf %383, %391 : vector<2x4xf32>
    %400 = arith.addf %398, %399 : vector<2x4xf32>
    %401 = math.tanh %400 : vector<2x4xf32>
    %402 = arith.mulf %397, %401 : vector<2x4xf32>
    %403 = tpu.concatenate %402, %370 in 1 : vector<2x4xf32>, vector<2x4xf32> -> vector<2x8xf32>
    %cst_73 = arith.constant dense<0.000000e+00> : vector<2x16xf32>
    %404 = tpu.matmul %403, %2, %cst_73 {dimension_numbers = #tpu.dot_dimension_numbers<[1], [0], [0], [1], [0, 0, 1, 1], [], []>} : vector<2x8xf32>, vector<8x16xf32>, vector<2x16xf32> -> vector<2x16xf32>
    %405 = vector.broadcast %3 : vector<1x16xf32> to vector<2x16xf32>
    %406 = arith.addf %404, %405 : vector<2x16xf32>
    %407 = vector.extract_strided_slice %406 {offsets = [0, 0], sizes = [2, 4], strides = [1, 1]} : vector<2x16xf32> to vector<2x4xf32>
    %408 = arith.negf %407 : vector<2x4xf32>
    %409 = math.exp %408 : vector<2x4xf32>
    %cst_74 = arith.constant 1.000000e+00 : f32
    %410 = vector.broadcast %cst_74 : f32 to vector<2x4xf32>
    %411 = arith.addf %410, %409 : vector<2x4xf32>
    %412 = arith.divf %410, %411 : vector<2x4xf32>
    %413 = vector.extract_strided_slice %406 {offsets = [0, 4], sizes = [2, 4], strides = [1, 1]} : vector<2x16xf32> to vector<2x4xf32>
    %414 = arith.negf %413 : vector<2x4xf32>
    %415 = math.exp %414 : vector<2x4xf32>
    %cst_75 = arith.constant 1.000000e+00 : f32
    %416 = vector.broadcast %cst_75 : f32 to vector<2x4xf32>
    %417 = arith.addf %416, %415 : vector<2x4xf32>
    %418 = arith.divf %416, %417 : vector<2x4xf32>
    %419 = vector.extract_strided_slice %406 {offsets = [0, 8], sizes = [2, 4], strides = [1, 1]} : vector<2x16xf32> to vector<2x4xf32>
    %420 = math.tanh %419 : vector<2x4xf32>
    %421 = vector.extract_strided_slice %406 {offsets = [0, 12], sizes = [2, 4], strides = [1, 1]} : vector<2x16xf32> to vector<2x4xf32>
    %422 = arith.negf %421 : vector<2x4xf32>
    %423 = math.exp %422 : vector<2x4xf32>
    %cst_76 = arith.constant 1.000000e+00 : f32
    %424 = vector.broadcast %cst_76 : f32 to vector<2x4xf32>
    %425 = arith.addf %424, %423 : vector<2x4xf32>
    %426 = arith.divf %424, %425 : vector<2x4xf32>
    %427 = arith.mulf %418, %368 : vector<2x4xf32>
    %428 = arith.mulf %412, %420 : vector<2x4xf32>
    %429 = arith.addf %427, %428 : vector<2x4xf32>
    %430 = math.tanh %429 : vector<2x4xf32>
    %431 = arith.mulf %426, %430 : vector<2x4xf32>
    %c7_i32 = arith.constant 7 : i32
    %432 = arith.index_cast %c7_i32 : i32 to index
    %c0_77 = arith.constant 0 : index
    %c0_78 = arith.constant 0 : index
    %433 = vector.load %arg0[%432, %c0_77, %c0_78] : memref<8x2x2xf32, #tpu.memory_space<vmem>>, vector<1x2x2xf32>
    %434 = vector.shape_cast %433 : vector<1x2x2xf32> to vector<2x2xf32>
    %435 = tpu.concatenate %434, %402 in 1 : vector<2x2xf32>, vector<2x4xf32> -> vector<2x6xf32>
    %cst_79 = arith.constant dense<0.000000e+00> : vector<2x16xf32>
    %436 = tpu.matmul %435, %0, %cst_79 {dimension_numbers = #tpu.dot_dimension_numbers<[1], [0], [0], [1], [0, 0, 1, 1], [], []>} : vector<2x6xf32>, vector<6x16xf32>, vector<2x16xf32> -> vector<2x16xf32>
    %437 = vector.broadcast %1 : vector<1x16xf32> to vector<2x16xf32>
    %438 = arith.addf %436, %437 : vector<2x16xf32>
    %439 = vector.extract_strided_slice %438 {offsets = [0, 0], sizes = [2, 4], strides = [1, 1]} : vector<2x16xf32> to vector<2x4xf32>
    %440 = arith.negf %439 : vector<2x4xf32>
    %441 = math.exp %440 : vector<2x4xf32>
    %cst_80 = arith.constant 1.000000e+00 : f32
    %442 = vector.broadcast %cst_80 : f32 to vector<2x4xf32>
    %443 = arith.addf %442, %441 : vector<2x4xf32>
    %444 = arith.divf %442, %443 : vector<2x4xf32>
    %445 = vector.extract_strided_slice %438 {offsets = [0, 4], sizes = [2, 4], strides = [1, 1]} : vector<2x16xf32> to vector<2x4xf32>
    %446 = arith.negf %445 : vector<2x4xf32>
    %447 = math.exp %446 : vector<2x4xf32>
    %cst_81 = arith.constant 1.000000e+00 : f32
    %448 = vector.broadcast %cst_81 : f32 to vector<2x4xf32>
    %449 = arith.addf %448, %447 : vector<2x4xf32>
    %450 = arith.divf %448, %449 : vector<2x4xf32>
    %451 = vector.extract_strided_slice %438 {offsets = [0, 8], sizes = [2, 4], strides = [1, 1]} : vector<2x16xf32> to vector<2x4xf32>
    %452 = math.tanh %451 : vector<2x4xf32>
    %453 = vector.extract_strided_slice %438 {offsets = [0, 12], sizes = [2, 4], strides = [1, 1]} : vector<2x16xf32> to vector<2x4xf32>
    %454 = arith.negf %453 : vector<2x4xf32>
    %455 = math.exp %454 : vector<2x4xf32>
    %cst_82 = arith.constant 1.000000e+00 : f32
    %456 = vector.broadcast %cst_82 : f32 to vector<2x4xf32>
    %457 = arith.addf %456, %455 : vector<2x4xf32>
    %458 = arith.divf %456, %457 : vector<2x4xf32>
    %459 = arith.mulf %450, %400 : vector<2x4xf32>
    %460 = arith.mulf %444, %452 : vector<2x4xf32>
    %461 = arith.addf %459, %460 : vector<2x4xf32>
    %462 = math.tanh %461 : vector<2x4xf32>
    %463 = arith.mulf %458, %462 : vector<2x4xf32>
    %464 = tpu.concatenate %463, %431 in 1 : vector<2x4xf32>, vector<2x4xf32> -> vector<2x8xf32>
    %cst_83 = arith.constant dense<0.000000e+00> : vector<2x16xf32>
    %465 = tpu.matmul %464, %2, %cst_83 {dimension_numbers = #tpu.dot_dimension_numbers<[1], [0], [0], [1], [0, 0, 1, 1], [], []>} : vector<2x8xf32>, vector<8x16xf32>, vector<2x16xf32> -> vector<2x16xf32>
    %466 = vector.broadcast %3 : vector<1x16xf32> to vector<2x16xf32>
    %467 = arith.addf %465, %466 : vector<2x16xf32>
    %468 = vector.extract_strided_slice %467 {offsets = [0, 0], sizes = [2, 4], strides = [1, 1]} : vector<2x16xf32> to vector<2x4xf32>
    %469 = arith.negf %468 : vector<2x4xf32>
    %470 = math.exp %469 : vector<2x4xf32>
    %cst_84 = arith.constant 1.000000e+00 : f32
    %471 = vector.broadcast %cst_84 : f32 to vector<2x4xf32>
    %472 = arith.addf %471, %470 : vector<2x4xf32>
    %473 = arith.divf %471, %472 : vector<2x4xf32>
    %474 = vector.extract_strided_slice %467 {offsets = [0, 4], sizes = [2, 4], strides = [1, 1]} : vector<2x16xf32> to vector<2x4xf32>
    %475 = arith.negf %474 : vector<2x4xf32>
    %476 = math.exp %475 : vector<2x4xf32>
    %cst_85 = arith.constant 1.000000e+00 : f32
    %477 = vector.broadcast %cst_85 : f32 to vector<2x4xf32>
    %478 = arith.addf %477, %476 : vector<2x4xf32>
    %479 = arith.divf %477, %478 : vector<2x4xf32>
    %480 = vector.extract_strided_slice %467 {offsets = [0, 8], sizes = [2, 4], strides = [1, 1]} : vector<2x16xf32> to vector<2x4xf32>
    %481 = math.tanh %480 : vector<2x4xf32>
    %482 = vector.extract_strided_slice %467 {offsets = [0, 12], sizes = [2, 4], strides = [1, 1]} : vector<2x16xf32> to vector<2x4xf32>
    %483 = arith.negf %482 : vector<2x4xf32>
    %484 = math.exp %483 : vector<2x4xf32>
    %cst_86 = arith.constant 1.000000e+00 : f32
    %485 = vector.broadcast %cst_86 : f32 to vector<2x4xf32>
    %486 = arith.addf %485, %484 : vector<2x4xf32>
    %487 = arith.divf %485, %486 : vector<2x4xf32>
    %488 = arith.mulf %479, %429 : vector<2x4xf32>
    %489 = arith.mulf %473, %481 : vector<2x4xf32>
    %490 = arith.addf %488, %489 : vector<2x4xf32>
    %491 = math.tanh %490 : vector<2x4xf32>
    %492 = arith.mulf %487, %491 : vector<2x4xf32>
    %c8_i32 = arith.constant 8 : i32
    %c0_87 = arith.constant 0 : index
    %c0_88 = arith.constant 0 : index
    %493 = vector.load %arg5[%c0_87, %c0_88] : memref<4x1xf32, #tpu.memory_space<vmem>>, vector<4x1xf32>
    %cst_89 = arith.constant dense<0.000000e+00> : vector<2x1xf32>
    %494 = tpu.matmul %492, %493, %cst_89 {dimension_numbers = #tpu.dot_dimension_numbers<[1], [0], [0], [1], [0, 0, 1, 1], [], []>} : vector<2x4xf32>, vector<4x1xf32>, vector<2x1xf32> -> vector<2x1xf32>
    %c0_90 = arith.constant 0 : index
    %c0_91 = arith.constant 0 : index
    %495 = vector.load %arg6[%c0_90, %c0_91] : memref<1x1xf32, #tpu.memory_space<vmem>>, vector<1x1xf32>
    %496 = vector.broadcast %495 : vector<1x1xf32> to vector<2x1xf32>
    %497 = arith.addf %494, %496 : vector<2x1xf32>
    %c0_92 = arith.constant 0 : index
    %c0_93 = arith.constant 0 : index
    %498 = vector.load %arg7[%c0_92, %c0_93] : memref<2x1xf32, #tpu.memory_space<vmem>>, vector<2x1xf32>
    tpu.vector_store %arg7[%c0_92, %c0_93], %497 {strides = array<i32>} : memref<2x1xf32, #tpu.memory_space<vmem>>, vector<2x1xf32>,
    return
  }
}

</mosaic_0001>

<bundles_post_ra>
// kernel: lstm_forward.1
= control target key start
LH: loop header
LB: loop body
LE: loop exit
PB: predicated region body
PF: predicated region fallthrough
CT: control target
= control target key end

     0   :  { %vm42_vm0 = vcmask 1045504   ;;  %vm33_vm1 = vcmask 15360   ;;  %vm38_vm2 = vcmask 48128   ;;  %s1345_s29 = smov 120   ;;  %s1346_s30 = smov 4   ;;  %vm107_vm7 = vcmask 31744   ;;  %s1643_s1 = inlined_call_operand.vmem [shape: f32[6,16], index: 1, kind: input, shape index: {}]   ;;  %s1644_s0 = inlined_call_operand.vmem [shape: f32[8,2,2], index: 0, kind: input, shape index: {}]   ;;  %s1645_s2 = inlined_call_operand.vmem [shape: f32[1,16], index: 2, kind: input, shape index: {}]   ;;  %s1646_s4 = inlined_call_operand.vmem [shape: f32[1,16], index: 4, kind: input, shape index: {}]   ;;  %s1647_s3 = inlined_call_operand.vmem [shape: f32[8,16], index: 3, kind: input, shape index: {}]   ;;  %s1648_s5 = inlined_call_operand.vmem [shape: f32[4,1], index: 5, kind: input, shape index: {}]   ;;  %s1649_s6 = inlined_call_operand.<no memory space> [shape: f32[1,1], index: 6, kind: input, shape index: {}]   ;;  %s1650_s7 = inlined_call_operand.vmem [shape: f32[2,1], index: 7, kind: output, shape index: {}]  }
   0x1   :  { %v1393_v0 = vld [vmem:[%s1643_s1] sm:$0x3f]  ;;  %s1347_s8 = smov 8   ;;  %s1348_s9 = smov 116   ;;  %vm112_vm8 = vcmask 64512  }
   0x2   :  { %v32_v1 = vld [vmem:[%s1644_s0] sm:$0x3]  ;;  %1158 = vmatpush.msk.msra.mxu0 %vm42_vm0, %v1393_v0  ;;  %1164 = vmatpush.msk.msra.mxu2 %vm42_vm0, %v1393_v0  ;;  %s1349_s10 = smov 118   ;;  %v1163_v31 = vld [vmem:[%s1644_s0 + $0x2] sm:$0x3] }
   0x3   :  { %v34_v2 = vsel %vm33_vm1, %v32_v1, 0.0  ;;  %v1413_v3 = vld [vmem:[%s1645_s2] ss:$0 sm:$0xff] }
   0x4   :  { %1159 = vmatmul.msk.f32.vlgmr.msra.gmra.mxu0 %vm38_vm2, %v34_v2  ;;  %1176 = vmatpush.msk.msrb.mxu2 %vm42_vm0, %v1393_v0  ;;  %v1427_v28 = vld [vmem:[%s1647_s3] sm:$0xff] }
   0x5   :  { %1170 = vmatpush.msk.msrb.mxu0 %vm42_vm0, %v1393_v0  ;;  %131 = vmatpush.msra.mxu1 %v1427_v28  ;;  %v1446_v34 = vld [vmem:[%s1646_s4] ss:$0 sm:$0xff] }
   0x6   :  { %266 = vmatpush.msra.mxu3 %v1427_v28 }
   0x7   :  { %1182 = vmatpush.msk.msra.mxu0 %vm42_vm0, %v1393_v0  ;;  %401 = vmatpush.msrb.mxu1 %v1427_v28 }
   0x8   :  { %536 = vmatpush.msrb.mxu3 %v1427_v28 }
  0x81   :  { %v63_v4 = vpop.f32.mrf.mxu0 }
  0x82   :  { %v64_v5 = vadd.f32 %v1413_v3, %v63_v4 }
  0x84   :  { %1215 = vtanh.f32 %v64_v5  ;;  %v1160_v7 = vmul.f32 -1.442695, %v64_v5 }
  0x86   :  { %1217 = vpow2.f32 %v1160_v7 }
  0x8a   :  { %v1216_v6 = vpop.eup %1215 }
  0x8b   :  { %88 = vrot.lane.b32.xlu0 %v1216_v6, %s1345_s29 }
  0x8c   :  { %v1218_v8 = vpop.eup %1217 }
  0x8d   :  { %v69_v9 = vadd.f32 1.0, %v1218_v8 }
  0x8f   :  { %1219 = vrcp.f32 %v69_v9  ;;  %v81_v15 = vand.u32 2147483648, %v69_v9  ;;  %vm75_vm4 = vweird.f32 %v69_v9  ;;  %v79_v16 = vand.u32 2147483647, %v69_v9 }
  0x91   :  { %v82_v18 = vor.u32 1.1754944e-38, %v81_v15  ;;  %vm80_vm6 = vcmp.eq.f32.partialorder %v79_v16, 8.507059e+37 }
  0x95   :  { %v1220_v10 = vpop.eup %1219 }
  0x96   :  { %v71_v11 = vmul.f32 %v1220_v10, %v69_v9  ;;  %vm76_vm3 = vweird.f32 %v1220_v10 }
  0x97   :  { %vm77_vm5 = vmor %vm75_vm4, %vm76_vm3 }
  0x98   :  { %v72_v12 = vsub.f32 1.0, %v71_v11 }
  0x9a   :  { %v73_v13 = vmul.f32 %v1220_v10, %v72_v12 }
  0x9c   :  { %v74_v14 = vadd.f32 %v1220_v10, %v73_v13 }
  0x9e   :  { %v78_v17 = vsel %vm77_vm5, %v1220_v10, %v74_v14 }
  0x9f   :  { %v83_v20 = vsel %vm80_vm6, %v82_v18, %v78_v17 }
  0xa0   :  { %v86_v22 = vmul.f32 0.0, %v83_v20 }
  0xfd   :  { %v89_v19 = vpop.permute.xlu0 %88 }
  0xfe   :  { %v91_v21 = vmul.f32 %v89_v19, %v83_v20 }
 0x100   :  { %93 = vrot.lane.b32.xlu0 %v91_v21, %s1346_s30 }
 0x172   :  { %v94_v23 = vpop.permute.xlu0 %93 }
 0x173   :  { %v1418_v24 = vadd.f32 %v94_v23, %v86_v22 }
 0x175   :  { %1221 = vtanh.f32 %v1418_v24 }
 0x17b   :  { %v1222_v25 = vpop.eup %1221 }
 0x17c   :  { %99 = vrot.lane.b32.xlu1 %v1222_v25, %s1347_s8 }
 0x1ee   :  { %v100_v26 = vpop.permute.xlu1 %99 }
 0x1ef   :  { %v102_v27 = vmul.f32 %v100_v26, %v83_v20 }
 0x1f1   :  { %104 = vrot.lane.b32.xlu2 %v102_v27, %s1348_s9  ;;  %175 = vrot.lane.b32.xlu1 %v102_v27, %s1349_s10 }
 0x24b   :  { %v105_v29 = vpop.permute.xlu2 %104 }
 0x24c   :  { %v108_v30 = vsel %vm107_vm7, %v105_v29, 0.0 }
 0x24d   :  { %1161 = vmatmul.msk.f32.vlgmr.msra.gmra.mxu1 %vm112_vm8, %v108_v30 }
 0x24e   :  { %671 = vmatpush.msra.mxu1 %v1427_v28 }
 0x263   :  { %v176_v32 = vpop.permute.xlu1 %175 }
 0x264   :  { %v178_v33 = vsel %vm33_vm1, %v1163_v31, %v176_v32 }
 0x265   :  { %1165 = vmatmul.msk.f32.vlgmr.msra.gmra.mxu2 %vm38_vm2, %v178_v33 }
 0x266   :  { %1188 = vmatpush.msk.msra.mxu2 %vm42_vm0, %v1393_v0 }
 0x2ca   :  { %v133_v35 = vpop.f32.mrf.mxu1 }
 0x2cb   :  { %v134_v36 = vadd.f32 %v1446_v34, %v133_v35 }
 0x2cd   :  { %1223 = vtanh.f32 %v134_v36  ;;  %v1162_v41 = vmul.f32 -1.442695, %v134_v36 }
 0x2d3   :  { %v1224_v37 = vpop.eup %1223 }
 0x2d4   :  { %158 = vrot.lane.b32.xlu2 %v1224_v37, %s1345_s29 }
 0x2e8   :  { %v199_v38 = vpop.f32.mrf.mxu2 }
 0x2e9   :  { %v200_v39 = vadd.f32 %v1413_v3, %v199_v38 }
 0x2eb   :  { %1225 = vtanh.f32 %v200_v39  ;;  %v1166_v56 = vmul.f32 -1.442695, %v200_v39 }
 0x2ec   :  { %1227 = vpow2.f32 %v1162_v41 }
 0x2f1   :  { %v1226_v40 = vpop.eup %1225 }
 0x2f2   :  { %224 = vrot.lane.b32.xlu0 %v1226_v40, %s1345_s29  ;;  %v1228_v42 = vpop.eup %1227 }
 0x2f3   :  { %v139_v43 = vadd.f32 1.0, %v1228_v42 }
 0x2f5   :  { %1229 = vrcp.f32 %v139_v43  ;;  %v151_v49 = vand.u32 2147483648, %v139_v43  ;;  %vm145_vm10 = vweird.f32 %v139_v43  ;;  %v149_v50 = vand.u32 2147483647, %v139_v43 }
 0x2f6   :  { %1231 = vpow2.f32 %v1166_v56 }
 0x2f7   :  { %v152_v52 = vor.u32 1.1754944e-38, %v151_v49  ;;  %vm150_vm12 = vcmp.eq.f32.partialorder %v149_v50, 8.507059e+37 }
 0x2fb   :  { %v1230_v44 = vpop.eup %1229 }
 0x2fc   :  { %v141_v45 = vmul.f32 %v1230_v44, %v139_v43  ;;  %vm146_vm9 = vweird.f32 %v1230_v44  ;;  %v1232_v57 = vpop.eup %1231 }
 0x2fd   :  { %vm147_vm11 = vmor %vm145_vm10, %vm146_vm9  ;;  %v205_v58 = vadd.f32 1.0, %v1232_v57 }
 0x2fe   :  { %v142_v46 = vsub.f32 1.0, %v141_v45 }
 0x2ff   :  { %1233 = vrcp.f32 %v205_v58  ;;  %v217_v1 = vand.u32 2147483648, %v205_v58  ;;  %vm211_vm14 = vweird.f32 %v205_v58  ;;  %v215_v2 = vand.u32 2147483647, %v205_v58 }
 0x300   :  { %v143_v47 = vmul.f32 %v1230_v44, %v142_v46 }
 0x301   :  { %v218_v5 = vor.u32 1.1754944e-38, %v217_v1  ;;  %vm216_vm3 = vcmp.eq.f32.partialorder %v215_v2, 8.507059e+37 }
 0x302   :  { %v144_v48 = vadd.f32 %v1230_v44, %v143_v47 }
 0x304   :  { %v148_v51 = vsel %vm147_vm11, %v1230_v44, %v144_v48 }
 0x305   :  { %v153_v54 = vsel %vm150_vm12, %v152_v52, %v148_v51  ;;  %v1234_v59 = vpop.eup %1233 }
 0x306   :  { %v207_v60 = vmul.f32 %v1234_v59, %v205_v58  ;;  %vm212_vm13 = vweird.f32 %v1234_v59  ;;  %v156_v9 = vmul.f32 0.0, %v153_v54 }
 0x307   :  { %vm213_vm15 = vmor %vm211_vm14, %vm212_vm13 }
 0x308   :  { %v208_v61 = vsub.f32 1.0, %v207_v60 }
 0x30a   :  { %v209_v62 = vmul.f32 %v1234_v59, %v208_v61 }
 0x30c   :  { %v210_v63 = vadd.f32 %v1234_v59, %v209_v62 }
 0x30e   :  { %v214_v4 = vsel %vm213_vm15, %v1234_v59, %v210_v63 }
 0x30f   :  { %v219_v7 = vsel %vm216_vm3, %v218_v5, %v214_v4 }
 0x310   :  { %v222_v13 = vmul.f32 %v219_v7, %v1418_v24  ;;  %v1169_v24 = vld [vmem:[%s1644_s0 + $0x4] sm:$0x3] }
 0x32e   :  { %v159_v53 = vpop.permute.xlu2 %158 }
 0x32f   :  { %v161_v55 = vmul.f32 %v159_v53, %v153_v54 }
 0x331   :  { %163 = vrot.lane.b32.xlu1 %v161_v55, %s1346_s30 }
 0x364   :  { %v225_v6 = vpop.permute.xlu0 %224 }
 0x365   :  { %v227_v8 = vmul.f32 %v225_v6, %v219_v7 }
 0x367   :  { %229 = vrot.lane.b32.xlu2 %v227_v8, %s1346_s30 }
 0x3a3   :  { %v164_v10 = vpop.permute.xlu1 %163 }
 0x3a4   :  { %v1454_v11 = vadd.f32 %v164_v10, %v156_v9 }
 0x3a6   :  { %1235 = vtanh.f32 %v1454_v11 }
 0x3ac   :  { %v1236_v12 = vpop.eup %1235 }
 0x3ad   :  { %169 = vrot.lane.b32.xlu0 %v1236_v12, %s1347_s8 }
 0x3c1   :  { %v230_v14 = vpop.permute.xlu2 %229 }
 0x3c2   :  { %v1459_v15 = vadd.f32 %v230_v14, %v222_v13 }
 0x3c4   :  { %1237 = vtanh.f32 %v1459_v15 }
 0x3ca   :  { %v1238_v16 = vpop.eup %1237 }
 0x3cb   :  { %235 = vrot.lane.b32.xlu1 %v1238_v16, %s1347_s8 }
 0x41f   :  { %v170_v17 = vpop.permute.xlu0 %169 }
 0x420   :  { %v172_v18 = vmul.f32 %v170_v17, %v153_v54 }
 0x422   :  { %244 = vrot.lane.b32.xlu0 %v172_v18, %s1345_s29 }
 0x43d   :  { %v236_v19 = vpop.permute.xlu1 %235 }
 0x43e   :  { %v238_v20 = vmul.f32 %v236_v19, %v219_v7 }
 0x440   :  { %310 = vrot.lane.b32.xlu1 %v238_v20, %s1349_s10  ;;  %240 = vrot.lane.b32.xlu2 %v238_v20, %s1348_s9 }
 0x494   :  { %v245_v21 = vpop.permute.xlu0 %244 }
 0x49a   :  { %v241_v22 = vpop.permute.xlu2 %240 }
 0x49b   :  { %v247_v23 = vsel %vm107_vm7, %v241_v22, %v245_v21 }
 0x49c   :  { %1167 = vmatmul.msk.f32.vlgmr.msra.gmra.mxu3 %vm112_vm8, %v247_v23 }
 0x49d   :  { %806 = vmatpush.msra.mxu3 %v1427_v28 }
 0x4b2   :  { %v311_v25 = vpop.permute.xlu1 %310 }
 0x4b3   :  { %v313_v26 = vsel %vm33_vm1, %v1169_v24, %v311_v25 }
 0x4b4   :  { %1171 = vmatmul.msk.f32.vlgmr.msrb.gmra.mxu0 %vm38_vm2, %v313_v26 }
 0x4b5   :  { %1194 = vmatpush.msk.msrb.mxu0 %vm42_vm0, %v1393_v0 }
 0x51f   :  { %v268_v27 = vpop.f32.mrf.mxu3 }
 0x520   :  { %v269_v29 = vadd.f32 %v1446_v34, %v268_v27 }
 0x522   :  { %1239 = vtanh.f32 %v269_v29  ;;  %v1168_v36 = vmul.f32 -1.442695, %v269_v29 }
 0x528   :  { %v1240_v30 = vpop.eup %1239 }
 0x529   :  { %293 = vrot.lane.b32.xlu0 %v1240_v30, %s1345_s29 }
 0x531   :  { %v334_v31 = vpop.f32.mrf.mxu0 }
 0x532   :  { %v335_v32 = vadd.f32 %v1413_v3, %v334_v31 }
 0x534   :  { %1241 = vtanh.f32 %v335_v32  ;;  %v1172_v35 = vmul.f32 -1.442695, %v335_v32 }
 0x536   :  { %1243 = vpow2.f32 %v1172_v35 }
 0x537   :  { %1245 = vpow2.f32 %v1168_v36 }
 0x53a   :  { %v1242_v33 = vpop.eup %1241 }
 0x53b   :  { %359 = vrot.lane.b32.xlu2 %v1242_v33, %s1345_s29 }
 0x53c   :  { %v1244_v37 = vpop.eup %1243 }
 0x53d   :  { %v340_v38 = vadd.f32 1.0, %v1244_v37  ;;  %v1246_v39 = vpop.eup %1245 }
 0x53e   :  { %v274_v40 = vadd.f32 1.0, %v1246_v39 }
 0x53f   :  { %1247 = vrcp.f32 %v340_v38  ;;  %v352_v49 = vand.u32 2147483648, %v340_v38  ;;  %vm346_vm5 = vweird.f32 %v340_v38  ;;  %v350_v50 = vand.u32 2147483647, %v340_v38 }
 0x540   :  { %1249 = vrcp.f32 %v274_v40  ;;  %v286_v57 = vand.u32 2147483648, %v274_v40  ;;  %vm280_vm11 = vweird.f32 %v274_v40  ;;  %v284_v59 = vand.u32 2147483647, %v274_v40 }
 0x541   :  { %v353_v53 = vor.u32 1.1754944e-38, %v352_v49  ;;  %vm351_vm9 = vcmp.eq.f32.partialorder %v350_v50, 8.507059e+37 }
 0x542   :  { %v287_v61 = vor.u32 1.1754944e-38, %v286_v57  ;;  %vm285_vm13 = vcmp.eq.f32.partialorder %v284_v59, 8.507059e+37 }
 0x545   :  { %v1248_v41 = vpop.eup %1247 }
 0x546   :  { %v342_v42 = vmul.f32 %v1248_v41, %v340_v38  ;;  %v1250_v43 = vpop.eup %1249  ;;  %vm347_vm4 = vweird.f32 %v1248_v41 }
 0x547   :  { %v276_v45 = vmul.f32 %v1250_v43, %v274_v40  ;;  %vm348_vm6 = vmor %vm346_vm5, %vm347_vm4  ;;  %vm281_vm10 = vweird.f32 %v1250_v43 }
 0x548   :  { %v343_v44 = vsub.f32 1.0, %v342_v42  ;;  %vm282_vm12 = vmor %vm280_vm11, %vm281_vm10 }
 0x549   :  { %v277_v47 = vsub.f32 1.0, %v276_v45 }
 0x54a   :  { %v344_v46 = vmul.f32 %v1248_v41, %v343_v44 }
 0x54b   :  { %v278_v51 = vmul.f32 %v1250_v43, %v277_v47 }
 0x54c   :  { %v345_v48 = vadd.f32 %v1248_v41, %v344_v46 }
 0x54d   :  { %v279_v54 = vadd.f32 %v1250_v43, %v278_v51 }
 0x54e   :  { %v349_v52 = vsel %vm348_vm6, %v1248_v41, %v345_v48 }
 0x54f   :  { %v354_v55 = vsel %vm351_vm9, %v353_v53, %v349_v52  ;;  %v283_v60 = vsel %vm282_vm12, %v1250_v43, %v279_v54 }
 0x550   :  { %v288_v63 = vsel %vm285_vm13, %v287_v61, %v283_v60  ;;  %v357_v7 = vmul.f32 %v354_v55, %v1459_v15  ;;  %v1175_v15 = vld [vmem:[%s1644_s0 + $0x6] sm:$0x3] }
 0x551   :  { %v291_v2 = vmul.f32 %v288_v63, %v1454_v11 }
 0x595   :  { %v360_v56 = vpop.permute.xlu2 %359 }
 0x596   :  { %v362_v58 = vmul.f32 %v360_v56, %v354_v55 }
 0x598   :  { %364 = vrot.lane.b32.xlu1 %v362_v58, %s1346_s30 }
 0x59b   :  { %v294_v62 = vpop.permute.xlu0 %293 }
 0x59c   :  { %v296_v1 = vmul.f32 %v294_v62, %v288_v63 }
 0x59e   :  { %298 = vrot.lane.b32.xlu2 %v296_v1, %s1346_s30 }
 0x5f8   :  { %v299_v4 = vpop.permute.xlu2 %298 }
 0x5f9   :  { %v1483_v5 = vadd.f32 %v299_v4, %v291_v2 }
 0x5fb   :  { %1251 = vtanh.f32 %v1483_v5 }
 0x601   :  { %v1252_v6 = vpop.eup %1251 }
 0x602   :  { %304 = vrot.lane.b32.xlu1 %v1252_v6, %s1347_s8 }
 0x60a   :  { %v365_v8 = vpop.permute.xlu1 %364 }
 0x60b   :  { %v1488_v9 = vadd.f32 %v365_v8, %v357_v7 }
 0x60d   :  { %1253 = vtanh.f32 %v1488_v9 }
 0x613   :  { %v1254_v10 = vpop.eup %1253 }
 0x614   :  { %370 = vrot.lane.b32.xlu0 %v1254_v10, %s1347_s8 }
 0x674   :  { %v305_v12 = vpop.permute.xlu1 %304 }
 0x675   :  { %v307_v11 = vmul.f32 %v305_v12, %v288_v63 }
 0x677   :  { %379 = vrot.lane.b32.xlu1 %v307_v11, %s1345_s29 }
 0x686   :  { %v371_v13 = vpop.permute.xlu0 %370 }
 0x687   :  { %v373_v14 = vmul.f32 %v371_v13, %v354_v55 }
 0x689   :  { %375 = vrot.lane.b32.xlu0 %v373_v14, %s1348_s9  ;;  %445 = vrot.lane.b32.xlu2 %v373_v14, %s1349_s10 }
 0x6e3   :  { %v446_v16 = vpop.permute.xlu2 %445 }
 0x6e4   :  { %v448_v17 = vsel %vm33_vm1, %v1175_v15, %v446_v16 }
 0x6e5   :  { %1177 = vmatmul.msk.f32.vlgmr.msrb.gmra.mxu2 %vm38_vm2, %v448_v17 }
 0x6e6   :  { %1200 = vmatpush.msk.msrb.mxu2 %vm42_vm0, %v1393_v0 }
 0x6e9   :  { %v380_v18 = vpop.permute.xlu1 %379 }
 0x6fb   :  { %v376_v19 = vpop.permute.xlu0 %375 }
 0x6fc   :  { %v382_v20 = vsel %vm107_vm7, %v376_v19, %v380_v18 }
 0x6fd   :  { %1173 = vmatmul.msk.f32.vlgmr.msrb.gmra.mxu1 %vm112_vm8, %v382_v20 }
 0x6fe   :  { %941 = vmatpush.msrb.mxu1 %v1427_v28 }
 0x768   :  { %v469_v21 = vpop.f32.mrf.mxu2 }
 0x769   :  { %v470_v22 = vadd.f32 %v1413_v3, %v469_v21 }
 0x76b   :  { %1255 = vtanh.f32 %v470_v22  ;;  %v1178_v27 = vmul.f32 -1.442695, %v470_v22 }
 0x771   :  { %v1256_v23 = vpop.eup %1255 }
 0x772   :  { %494 = vrot.lane.b32.xlu0 %v1256_v23, %s1345_s29 }
 0x77a   :  { %v403_v24 = vpop.f32.mrf.mxu1 }
 0x77b   :  { %v404_v25 = vadd.f32 %v1446_v34, %v403_v24 }
 0x77d   :  { %1257 = vtanh.f32 %v404_v25  ;;  %v1174_v26 = vmul.f32 -1.442695, %v404_v25 }
 0x77f   :  { %1259 = vpow2.f32 %v1174_v26 }
 0x780   :  { %1261 = vpow2.f32 %v1178_v27 }
 0x783   :  { %v1258_v0 = vpop.eup %1257 }
 0x784   :  { %428 = vrot.lane.b32.xlu2 %v1258_v0, %s1345_s29 }
 0x785   :  { %v1260_v29 = vpop.eup %1259 }
 0x786   :  { %v409_v30 = vadd.f32 1.0, %v1260_v29  ;;  %v1262_v31 = vpop.eup %1261 }
 0x787   :  { %v475_v32 = vadd.f32 1.0, %v1262_v31 }
 0x788   :  { %1263 = vrcp.f32 %v409_v30  ;;  %v421_v42 = vand.u32 2147483648, %v409_v30  ;;  %vm415_vm14 = vweird.f32 %v409_v30  ;;  %v419_v43 = vand.u32 2147483647, %v409_v30 }
 0x789   :  { %1265 = vrcp.f32 %v475_v32  ;;  %v487_v50 = vand.u32 2147483648, %v475_v32  ;;  %vm481_vm5 = vweird.f32 %v475_v32  ;;  %v485_v52 = vand.u32 2147483647, %v475_v32 }
 0x78a   :  { %v422_v46 = vor.u32 1.1754944e-38, %v421_v42  ;;  %vm420_vm3 = vcmp.eq.f32.partialorder %v419_v43, 8.507059e+37 }
 0x78b   :  { %v488_v54 = vor.u32 1.1754944e-38, %v487_v50  ;;  %vm486_vm9 = vcmp.eq.f32.partialorder %v485_v52, 8.507059e+37 }
 0x78e   :  { %v1264_v33 = vpop.eup %1263 }
 0x78f   :  { %v411_v35 = vmul.f32 %v1264_v33, %v409_v30  ;;  %v1266_v36 = vpop.eup %1265  ;;  %vm416_vm0 = vweird.f32 %v1264_v33 }
 0x790   :  { %v477_v38 = vmul.f32 %v1266_v36, %v475_v32  ;;  %vm417_vm15 = vmor %vm415_vm14, %vm416_vm0  ;;  %vm482_vm4 = vweird.f32 %v1266_v36 }
 0x791   :  { %v412_v37 = vsub.f32 1.0, %v411_v35  ;;  %vm483_vm6 = vmor %vm481_vm5, %vm482_vm4 }
 0x792   :  { %v478_v40 = vsub.f32 1.0, %v477_v38 }
 0x793   :  { %v413_v39 = vmul.f32 %v1264_v33, %v412_v37 }
 0x794   :  { %v479_v44 = vmul.f32 %v1266_v36, %v478_v40 }
 0x795   :  { %v414_v41 = vadd.f32 %v1264_v33, %v413_v39 }
 0x796   :  { %v480_v47 = vadd.f32 %v1266_v36, %v479_v44 }
 0x797   :  { %v418_v45 = vsel %vm417_vm15, %v1264_v33, %v414_v41 }
 0x798   :  { %v423_v48 = vsel %vm420_vm3, %v422_v46, %v418_v45  ;;  %v484_v53 = vsel %vm483_vm6, %v1266_v36, %v480_v47 }
 0x799   :  { %v489_v56 = vsel %vm486_vm9, %v488_v54, %v484_v53  ;;  %v426_v62 = vmul.f32 %v423_v48, %v1483_v5  ;;  %v1181_v5 = vld [vmem:[%s1644_s0 + $0x8] sm:$0x3] }
 0x79a   :  { %v492_v58 = vmul.f32 %v489_v56, %v1488_v9 }
 0x7de   :  { %v429_v49 = vpop.permute.xlu2 %428 }
 0x7df   :  { %v431_v51 = vmul.f32 %v429_v49, %v423_v48 }
 0x7e1   :  { %433 = vrot.lane.b32.xlu1 %v431_v51, %s1346_s30 }
 0x7e4   :  { %v495_v55 = vpop.permute.xlu0 %494 }
 0x7e5   :  { %v497_v57 = vmul.f32 %v495_v55, %v489_v56 }
 0x7e7   :  { %499 = vrot.lane.b32.xlu2 %v497_v57, %s1346_s30 }
 0x841   :  { %v500_v59 = vpop.permute.xlu2 %499 }
 0x842   :  { %v1512_v60 = vadd.f32 %v500_v59, %v492_v58 }
 0x844   :  { %1267 = vtanh.f32 %v1512_v60 }
 0x84a   :  { %v1268_v61 = vpop.eup %1267 }
 0x84b   :  { %505 = vrot.lane.b32.xlu1 %v1268_v61, %s1347_s8 }
 0x853   :  { %v434_v63 = vpop.permute.xlu1 %433 }
 0x854   :  { %v1517_v1 = vadd.f32 %v434_v63, %v426_v62  ;;  %v1187_v62 = vld [vmem:[%s1644_s0 + $0xa] sm:$0x3] }
 0x856   :  { %1269 = vtanh.f32 %v1517_v1 }
 0x85c   :  { %v1270_v2 = vpop.eup %1269 }
 0x85d   :  { %439 = vrot.lane.b32.xlu0 %v1270_v2, %s1347_s8 }
 0x8bd   :  { %v506_v4 = vpop.permute.xlu1 %505 }
 0x8be   :  { %v508_v6 = vmul.f32 %v506_v4, %v489_v56 }
 0x8c0   :  { %580 = vrot.lane.b32.xlu1 %v508_v6, %s1349_s10  ;;  %510 = vrot.lane.b32.xlu2 %v508_v6, %s1348_s9 }
 0x8cf   :  { %v440_v7 = vpop.permute.xlu0 %439 }
 0x8d0   :  { %v442_v8 = vmul.f32 %v440_v7, %v423_v48 }
 0x8d2   :  { %514 = vrot.lane.b32.xlu0 %v442_v8, %s1345_s29 }
 0x91a   :  { %v511_v12 = vpop.permute.xlu2 %510 }
 0x932   :  { %v581_v9 = vpop.permute.xlu1 %580 }
 0x933   :  { %v583_v10 = vsel %vm33_vm1, %v1181_v5, %v581_v9 }
 0x934   :  { %1183 = vmatmul.msk.f32.vlgmr.msra.gmra.mxu0 %vm38_vm2, %v583_v10 }
 0x944   :  { %v515_v11 = vpop.permute.xlu0 %514 }
 0x945   :  { %v517_v13 = vsel %vm107_vm7, %v511_v12, %v515_v11 }
 0x946   :  { %1179 = vmatmul.msk.f32.vlgmr.msrb.gmra.mxu3 %vm112_vm8, %v517_v13 }
 0x947   :  { %1076 = vmatpush.msrb.mxu3 %v1427_v28 }
 0x9b1   :  { %v604_v14 = vpop.f32.mrf.mxu0 }
 0x9b2   :  { %v605_v15 = vadd.f32 %v1413_v3, %v604_v14 }
 0x9b4   :  { %1271 = vtanh.f32 %v605_v15  ;;  %v1184_v20 = vmul.f32 -1.442695, %v605_v15 }
 0x9ba   :  { %v1272_v16 = vpop.eup %1271 }
 0x9bb   :  { %629 = vrot.lane.b32.xlu2 %v1272_v16, %s1345_s29 }
 0x9c9   :  { %v538_v17 = vpop.f32.mrf.mxu3 }
 0x9ca   :  { %v539_v18 = vadd.f32 %v1446_v34, %v538_v17 }
 0x9cc   :  { %1273 = vtanh.f32 %v539_v18  ;;  %v1180_v35 = vmul.f32 -1.442695, %v539_v18 }
 0x9cd   :  { %1275 = vpow2.f32 %v1184_v20 }
 0x9d2   :  { %v1274_v19 = vpop.eup %1273 }
 0x9d3   :  { %563 = vrot.lane.b32.xlu0 %v1274_v19, %s1345_s29  ;;  %v1276_v21 = vpop.eup %1275 }
 0x9d4   :  { %v610_v22 = vadd.f32 1.0, %v1276_v21 }
 0x9d6   :  { %1277 = vrcp.f32 %v610_v22  ;;  %v622_v26 = vand.u32 2147483648, %v610_v22  ;;  %vm616_vm11 = vweird.f32 %v610_v22  ;;  %v620_v27 = vand.u32 2147483647, %v610_v22 }
 0x9d7   :  { %1279 = vpow2.f32 %v1180_v35 }
 0x9d8   :  { %v623_v30 = vor.u32 1.1754944e-38, %v622_v26  ;;  %vm621_vm13 = vcmp.eq.f32.partialorder %v620_v27, 8.507059e+37 }
 0x9dc   :  { %v1278_v28 = vpop.eup %1277 }
 0x9dd   :  { %v612_v23 = vmul.f32 %v1278_v28, %v610_v22  ;;  %vm617_vm10 = vweird.f32 %v1278_v28  ;;  %v1280_v36 = vpop.eup %1279 }
 0x9de   :  { %vm618_vm12 = vmor %vm616_vm11, %vm617_vm10  ;;  %v544_v37 = vadd.f32 1.0, %v1280_v36 }
 0x9df   :  { %v613_v24 = vsub.f32 1.0, %v612_v23 }
 0x9e0   :  { %1281 = vrcp.f32 %v544_v37  ;;  %v556_v43 = vand.u32 2147483648, %v544_v37  ;;  %vm550_vm14 = vweird.f32 %v544_v37  ;;  %v554_v44 = vand.u32 2147483647, %v544_v37 }
 0x9e1   :  { %v614_v25 = vmul.f32 %v1278_v28, %v613_v24 }
 0x9e2   :  { %v557_v46 = vor.u32 1.1754944e-38, %v556_v43  ;;  %vm555_vm3 = vcmp.eq.f32.partialorder %v554_v44, 8.507059e+37 }
 0x9e3   :  { %v615_v0 = vadd.f32 %v1278_v28, %v614_v25 }
 0x9e5   :  { %v619_v29 = vsel %vm618_vm12, %v1278_v28, %v615_v0 }
 0x9e6   :  { %v624_v31 = vsel %vm621_vm13, %v623_v30, %v619_v29  ;;  %v1282_v38 = vpop.eup %1281 }
 0x9e7   :  { %v546_v39 = vmul.f32 %v1282_v38, %v544_v37  ;;  %vm551_vm0 = vweird.f32 %v1282_v38  ;;  %v627_v50 = vmul.f32 %v624_v31, %v1512_v60 }
 0x9e8   :  { %vm552_vm15 = vmor %vm550_vm14, %vm551_vm0 }
 0x9e9   :  { %v547_v40 = vsub.f32 1.0, %v546_v39 }
 0x9eb   :  { %v548_v41 = vmul.f32 %v1282_v38, %v547_v40 }
 0x9ed   :  { %v549_v42 = vadd.f32 %v1282_v38, %v548_v41 }
 0x9ef   :  { %v553_v45 = vsel %vm552_vm15, %v1282_v38, %v549_v42 }
 0x9f0   :  { %v558_v48 = vsel %vm555_vm3, %v557_v46, %v553_v45 }
 0x9f1   :  { %v561_v54 = vmul.f32 %v558_v48, %v1517_v1 }
 0xa15   :  { %v630_v32 = vpop.permute.xlu2 %629 }
 0xa16   :  { %v632_v33 = vmul.f32 %v630_v32, %v624_v31 }
 0xa18   :  { %634 = vrot.lane.b32.xlu1 %v632_v33, %s1346_s30 }
 0xa45   :  { %v564_v47 = vpop.permute.xlu0 %563 }
 0xa46   :  { %v566_v49 = vmul.f32 %v564_v47, %v558_v48 }
 0xa48   :  { %568 = vrot.lane.b32.xlu2 %v566_v49, %s1346_s30 }
 0xa8a   :  { %v635_v51 = vpop.permute.xlu1 %634 }
 0xa8b   :  { %v1539_v52 = vadd.f32 %v635_v51, %v627_v50 }
 0xa8d   :  { %1283 = vtanh.f32 %v1539_v52 }
 0xa93   :  { %v1284_v53 = vpop.eup %1283 }
 0xa94   :  { %640 = vrot.lane.b32.xlu0 %v1284_v53, %s1347_s8 }
 0xaa2   :  { %v569_v55 = vpop.permute.xlu2 %568 }
 0xaa3   :  { %v1544_v56 = vadd.f32 %v569_v55, %v561_v54  ;;  %v1193_v54 = vld [vmem:[%s1644_s0 + $0xc] sm:$0x3] }
 0xaa5   :  { %1285 = vtanh.f32 %v1544_v56 }
 0xaab   :  { %v1286_v57 = vpop.eup %1285 }
 0xaac   :  { %574 = vrot.lane.b32.xlu1 %v1286_v57, %s1347_s8 }
 0xb06   :  { %v641_v58 = vpop.permute.xlu0 %640 }
 0xb07   :  { %v643_v59 = vmul.f32 %v641_v58, %v624_v31 }
 0xb09   :  { %645 = vrot.lane.b32.xlu0 %v643_v59, %s1348_s9  ;;  %715 = vrot.lane.b32.xlu2 %v643_v59, %s1349_s10 }
 0xb1e   :  { %v575_v60 = vpop.permute.xlu1 %574 }
 0xb1f   :  { %v577_v61 = vmul.f32 %v575_v60, %v558_v48 }
 0xb21   :  { %649 = vrot.lane.b32.xlu1 %v577_v61, %s1345_s29 }
 0xb63   :  { %v716_v63 = vpop.permute.xlu2 %715 }
 0xb64   :  { %v718_v1 = vsel %vm33_vm1, %v1187_v62, %v716_v63 }
 0xb65   :  { %1189 = vmatmul.msk.f32.vlgmr.msra.gmra.mxu2 %vm38_vm2, %v718_v1 }
 0xb7b   :  { %v646_v2 = vpop.permute.xlu0 %645 }
 0xb93   :  { %v650_v4 = vpop.permute.xlu1 %649 }
 0xb94   :  { %v652_v6 = vsel %vm107_vm7, %v646_v2, %v650_v4 }
 0xb95   :  { %1185 = vmatmul.msk.f32.vlgmr.msra.gmra.mxu1 %vm112_vm8, %v652_v6 }
 0xbe8   :  { %v739_v7 = vpop.f32.mrf.mxu2 }
 0xbe9   :  { %v740_v8 = vadd.f32 %v1413_v3, %v739_v7 }
 0xbeb   :  { %1287 = vtanh.f32 %v740_v8  ;;  %v1190_v11 = vmul.f32 -1.442695, %v740_v8 }
 0xbf1   :  { %v1288_v5 = vpop.eup %1287 }
 0xbf2   :  { %764 = vrot.lane.b32.xlu0 %v1288_v5, %s1345_s29 }
 0xc12   :  { %v673_v9 = vpop.f32.mrf.mxu1 }
 0xc13   :  { %v674_v10 = vadd.f32 %v1446_v34, %v673_v9 }
 0xc15   :  { %1289 = vtanh.f32 %v674_v10  ;;  %v1186_v15 = vmul.f32 -1.442695, %v674_v10 }
 0xc16   :  { %1291 = vpow2.f32 %v1190_v11 }
 0xc1b   :  { %v1290_v12 = vpop.eup %1289 }
 0xc1c   :  { %698 = vrot.lane.b32.xlu2 %v1290_v12, %s1345_s29  ;;  %v1292_v13 = vpop.eup %1291 }
 0xc1d   :  { %v745_v14 = vadd.f32 1.0, %v1292_v13 }
 0xc1f   :  { %1293 = vrcp.f32 %v745_v14  ;;  %v757_v28 = vand.u32 2147483648, %v745_v14  ;;  %vm751_vm5 = vweird.f32 %v745_v14  ;;  %v755_v23 = vand.u32 2147483647, %v745_v14 }
 0xc20   :  { %1295 = vpow2.f32 %v1186_v15 }
 0xc21   :  { %v758_v0 = vor.u32 1.1754944e-38, %v757_v28  ;;  %vm756_vm9 = vcmp.eq.f32.partialorder %v755_v23, 8.507059e+37 }
 0xc25   :  { %v1294_v16 = vpop.eup %1293 }
 0xc26   :  { %v747_v17 = vmul.f32 %v1294_v16, %v745_v14  ;;  %v1296_v18 = vpop.eup %1295  ;;  %vm752_vm4 = vweird.f32 %v1294_v16 }
 0xc27   :  { %v679_v20 = vadd.f32 1.0, %v1296_v18  ;;  %vm753_vm6 = vmor %vm751_vm5, %vm752_vm4 }
 0xc28   :  { %v748_v19 = vsub.f32 1.0, %v747_v17 }
 0xc29   :  { %1297 = vrcp.f32 %v679_v20  ;;  %v691_v35 = vand.u32 2147483648, %v679_v20  ;;  %vm685_vm11 = vweird.f32 %v679_v20  ;;  %v689_v36 = vand.u32 2147483647, %v679_v20 }
 0xc2a   :  { %v749_v21 = vmul.f32 %v1294_v16, %v748_v19 }
 0xc2b   :  { %v692_v38 = vor.u32 1.1754944e-38, %v691_v35  ;;  %vm690_vm13 = vcmp.eq.f32.partialorder %v689_v36, 8.507059e+37 }
 0xc2c   :  { %v750_v22 = vadd.f32 %v1294_v16, %v749_v21 }
 0xc2e   :  { %v754_v25 = vsel %vm753_vm6, %v1294_v16, %v750_v22 }
 0xc2f   :  { %v1298_v24 = vpop.eup %1297  ;;  %v759_v29 = vsel %vm756_vm9, %v758_v0, %v754_v25 }
 0xc30   :  { %v681_v26 = vmul.f32 %v1298_v24, %v679_v20  ;;  %vm686_vm10 = vweird.f32 %v1298_v24  ;;  %v762_v42 = vmul.f32 %v759_v29, %v1539_v52 }
 0xc31   :  { %vm687_vm12 = vmor %vm685_vm11, %vm686_vm10 }
 0xc32   :  { %v682_v31 = vsub.f32 1.0, %v681_v26 }
 0xc34   :  { %v683_v32 = vmul.f32 %v1298_v24, %v682_v31 }
 0xc36   :  { %v684_v33 = vadd.f32 %v1298_v24, %v683_v32 }
 0xc38   :  { %v688_v37 = vsel %vm687_vm12, %v1298_v24, %v684_v33 }
 0xc39   :  { %v693_v39 = vsel %vm690_vm13, %v692_v38, %v688_v37 }
 0xc3a   :  { %v696_v46 = vmul.f32 %v693_v39, %v1544_v56 }
 0xc64   :  { %v765_v27 = vpop.permute.xlu0 %764 }
 0xc65   :  { %v767_v30 = vmul.f32 %v765_v27, %v759_v29 }
 0xc67   :  { %769 = vrot.lane.b32.xlu2 %v767_v30, %s1346_s30 }
 0xc76   :  { %v699_v40 = vpop.permute.xlu2 %698 }
 0xc77   :  { %v701_v41 = vmul.f32 %v699_v40, %v693_v39 }
 0xc79   :  { %703 = vrot.lane.b32.xlu1 %v701_v41, %s1346_s30 }
 0xcc1   :  { %v770_v43 = vpop.permute.xlu2 %769 }
 0xcc2   :  { %v1565_v44 = vadd.f32 %v770_v43, %v762_v42 }
 0xcc4   :  { %1299 = vtanh.f32 %v1565_v44 }
 0xcca   :  { %v1300_v45 = vpop.eup %1299 }
 0xccb   :  { %775 = vrot.lane.b32.xlu1 %v1300_v45, %s1347_s8  ;;  %v1199_v45 = vld [vmem:[%s1644_s0 + $0xe] sm:$0x3] }
 0xceb   :  { %v704_v47 = vpop.permute.xlu1 %703 }
 0xcec   :  { %v1570_v48 = vadd.f32 %v704_v47, %v696_v46 }
 0xcee   :  { %1301 = vtanh.f32 %v1570_v48 }
 0xcf4   :  { %v1302_v49 = vpop.eup %1301 }
 0xcf5   :  { %709 = vrot.lane.b32.xlu0 %v1302_v49, %s1347_s8 }
 0xd3d   :  { %v776_v50 = vpop.permute.xlu1 %775 }
 0xd3e   :  { %v778_v51 = vmul.f32 %v776_v50, %v759_v29 }
 0xd40   :  { %850 = vrot.lane.b32.xlu1 %v778_v51, %s1349_s10  ;;  %780 = vrot.lane.b32.xlu2 %v778_v51, %s1348_s9 }
 0xd67   :  { %v710_v52 = vpop.permute.xlu0 %709 }
 0xd68   :  { %v712_v53 = vmul.f32 %v710_v52, %v693_v39  ;;  %v1343_v52 = vld [vmem:[%s1645_s2] ss:$0 sm:$0xff] }
 0xd6a   :  { %784 = vrot.lane.b32.xlu0 %v712_v53, %s1345_s29 }
 0xd9a   :  { %v781_v57 = vpop.permute.xlu2 %780 }
 0xdb2   :  { %v851_v55 = vpop.permute.xlu1 %850 }
 0xdb3   :  { %v853_v56 = vsel %vm33_vm1, %v1193_v54, %v851_v55 }
 0xdb4   :  { %1195 = vmatmul.msk.f32.vlgmr.msrb.gmra.mxu0 %vm38_vm2, %v853_v56 }
 0xddc   :  { %v785_v58 = vpop.permute.xlu0 %784 }
 0xddd   :  { %v787_v59 = vsel %vm107_vm7, %v781_v57, %v785_v58 }
 0xdde   :  { %1191 = vmatmul.msk.f32.vlgmr.msra.gmra.mxu3 %vm112_vm8, %v787_v59 }
 0xe31   :  { %v874_v60 = vpop.f32.mrf.mxu0 }
 0xe32   :  { %v875_v61 = vadd.f32 %v1413_v3, %v874_v60 }
 0xe34   :  { %1303 = vtanh.f32 %v875_v61  ;;  %v1196_v2 = vmul.f32 -1.442695, %v875_v61 }
 0xe3a   :  { %v1304_v62 = vpop.eup %1303 }
 0xe3b   :  { %899 = vrot.lane.b32.xlu2 %v1304_v62, %s1345_s29 }
 0xe61   :  { %v808_v63 = vpop.f32.mrf.mxu3 }
 0xe62   :  { %v809_v1 = vadd.f32 %v1446_v34, %v808_v63 }
 0xe64   :  { %1305 = vtanh.f32 %v809_v1  ;;  %v1192_v18 = vmul.f32 -1.442695, %v809_v1 }
 0xe65   :  { %1307 = vpow2.f32 %v1196_v2 }
 0xe6a   :  { %v1306_v4 = vpop.eup %1305 }
 0xe6b   :  { %833 = vrot.lane.b32.xlu0 %v1306_v4, %s1345_s29  ;;  %v1308_v6 = vpop.eup %1307 }
 0xe6c   :  { %v880_v7 = vadd.f32 1.0, %v1308_v6 }
 0xe6e   :  { %1309 = vrcp.f32 %v880_v7  ;;  %v892_v12 = vand.u32 2147483648, %v880_v7  ;;  %vm886_vm14 = vweird.f32 %v880_v7  ;;  %v890_v11 = vand.u32 2147483647, %v880_v7 }
 0xe6f   :  { %1311 = vpow2.f32 %v1192_v18 }
 0xe70   :  { %v893_v14 = vor.u32 1.1754944e-38, %v892_v12  ;;  %vm891_vm3 = vcmp.eq.f32.partialorder %v890_v11, 8.507059e+37 }
 0xe74   :  { %v1310_v8 = vpop.eup %1309 }
 0xe75   :  { %v882_v5 = vmul.f32 %v1310_v8, %v880_v7  ;;  %vm887_vm0 = vweird.f32 %v1310_v8  ;;  %v1312_v19 = vpop.eup %1311 }
 0xe76   :  { %vm888_vm15 = vmor %vm886_vm14, %vm887_vm0  ;;  %v814_v20 = vadd.f32 1.0, %v1312_v19 }
 0xe77   :  { %v883_v9 = vsub.f32 1.0, %v882_v5 }
 0xe78   :  { %1313 = vrcp.f32 %v814_v20  ;;  %v826_v25 = vand.u32 2147483648, %v814_v20  ;;  %vm820_vm5 = vweird.f32 %v814_v20  ;;  %v824_v0 = vand.u32 2147483647, %v814_v20 }
 0xe79   :  { %v884_v3 = vmul.f32 %v1310_v8, %v883_v9 }
 0xe7a   :  { %v827_v27 = vor.u32 1.1754944e-38, %v826_v25  ;;  %vm825_vm9 = vcmp.eq.f32.partialorder %v824_v0, 8.507059e+37 }
 0xe7b   :  { %v885_v10 = vadd.f32 %v1310_v8, %v884_v3 }
 0xe7d   :  { %v889_v13 = vsel %vm888_vm15, %v1310_v8, %v885_v10 }
 0xe7e   :  { %v894_v15 = vsel %vm891_vm3, %v893_v14, %v889_v13  ;;  %v1314_v21 = vpop.eup %1313 }
 0xe7f   :  { %v816_v22 = vmul.f32 %v1314_v21, %v814_v20  ;;  %vm821_vm4 = vweird.f32 %v1314_v21  ;;  %v897_v32 = vmul.f32 %v894_v15, %v1565_v44 }
 0xe80   :  { %vm822_vm6 = vmor %vm820_vm5, %vm821_vm4  ;;  %vm1128_vm5 = vcmask 1043456  }
 0xe81   :  { %v817_v28 = vsub.f32 1.0, %v816_v22 }
 0xe83   :  { %v818_v23 = vmul.f32 %v1314_v21, %v817_v28 }
 0xe85   :  { %v819_v24 = vadd.f32 %v1314_v21, %v818_v23 }
 0xe87   :  { %v823_v26 = vsel %vm822_vm6, %v1314_v21, %v819_v24  ;;  %vm1152_vm6 = vcmask 1024  }
 0xe88   :  { %v828_v30 = vsel %vm825_vm9, %v827_v27, %v823_v26 }
 0xe89   :  { %v831_v37 = vmul.f32 %v828_v30, %v1570_v48 }
 0xe95   :  { %v900_v16 = vpop.permute.xlu2 %899 }
 0xe96   :  { %v902_v17 = vmul.f32 %v900_v16, %v894_v15 }
 0xe98   :  { %904 = vrot.lane.b32.xlu1 %v902_v17, %s1346_s30 }
 0xedd   :  { %v834_v29 = vpop.permute.xlu0 %833 }
 0xede   :  { %v836_v31 = vmul.f32 %v834_v29, %v828_v30 }
 0xee0   :  { %838 = vrot.lane.b32.xlu2 %v836_v31, %s1346_s30 }
 0xf0a   :  { %v905_v33 = vpop.permute.xlu1 %904 }
 0xf0b   :  { %v1591_v35 = vadd.f32 %v905_v33, %v897_v32 }
 0xf0d   :  { %1315 = vtanh.f32 %v1591_v35 }
 0xf13   :  { %v1316_v36 = vpop.eup %1315 }
 0xf14   :  { %910 = vrot.lane.b32.xlu0 %v1316_v36, %s1347_s8 }
 0xf3a   :  { %v839_v38 = vpop.permute.xlu2 %838 }
 0xf3b   :  { %v1596_v39 = vadd.f32 %v839_v38, %v831_v37 }
 0xf3d   :  { %1317 = vtanh.f32 %v1596_v39 }
 0xf43   :  { %v1318_v40 = vpop.eup %1317 }
 0xf44   :  { %844 = vrot.lane.b32.xlu1 %v1318_v40, %s1347_s8  ;;  %v1344_v40 = vld [vmem:[%s1646_s4] ss:$0 sm:$0xff] }
 0xf86   :  { %v911_v41 = vpop.permute.xlu0 %910 }
 0xf87   :  { %v913_v42 = vmul.f32 %v911_v41, %v894_v15 }
 0xf89   :  { %915 = vrot.lane.b32.xlu0 %v913_v42, %s1348_s9  ;;  %985 = vrot.lane.b32.xlu2 %v913_v42, %s1349_s10 }
 0xfb6   :  { %v845_v43 = vpop.permute.xlu1 %844 }
 0xfb7   :  { %v847_v44 = vmul.f32 %v845_v43, %v828_v30 }
 0xfb9   :  { %919 = vrot.lane.b32.xlu1 %v847_v44, %s1345_s29 }
 0xfe3   :  { %v986_v46 = vpop.permute.xlu2 %985 }
 0xfe4   :  { %v988_v47 = vsel %vm33_vm1, %v1199_v45, %v986_v46 }
 0xfe5   :  { %1201 = vmatmul.msk.f32.vlgmr.msrb.gmra.mxu2 %vm38_vm2, %v988_v47 }
 0xffb   :  { %v916_v48 = vpop.permute.xlu0 %915 }
0x102b   :  { %v920_v49 = vpop.permute.xlu1 %919 }
0x102c   :  { %v922_v50 = vsel %vm107_vm7, %v916_v48, %v920_v49 }
0x102d   :  { %1197 = vmatmul.msk.f32.vlgmr.msrb.gmra.mxu1 %vm112_vm8, %v922_v50 }
0x1068   :  { %v1009_v51 = vpop.f32.mrf.mxu2 }
0x1069   :  { %v1010_v53 = vadd.f32 %v1343_v52, %v1009_v51 }
0x106b   :  { %1319 = vtanh.f32 %v1010_v53  ;;  %v1202_v58 = vmul.f32 -1.442695, %v1010_v53 }
0x1071   :  { %v1320_v54 = vpop.eup %1319 }
0x1072   :  { %1034 = vrot.lane.b32.xlu0 %v1320_v54, %s1345_s29 }
0x10aa   :  { %v943_v55 = vpop.f32.mrf.mxu1 }
0x10ab   :  { %v944_v56 = vadd.f32 %v1446_v34, %v943_v55 }
0x10ad   :  { %1321 = vtanh.f32 %v944_v56  ;;  %v1198_v34 = vmul.f32 -1.442695, %v944_v56 }
0x10ae   :  { %1323 = vpow2.f32 %v1202_v58 }
0x10b3   :  { %v1322_v57 = vpop.eup %1321 }
0x10b4   :  { %968 = vrot.lane.b32.xlu2 %v1322_v57, %s1345_s29  ;;  %v1324_v59 = vpop.eup %1323 }
0x10b5   :  { %v1015_v60 = vadd.f32 1.0, %v1324_v59 }
0x10b7   :  { %1325 = vrcp.f32 %v1015_v60  ;;  %v1027_v4 = vand.u32 2147483648, %v1015_v60  ;;  %vm1021_vm2 = vweird.f32 %v1015_v60  ;;  %v1025_v6 = vand.u32 2147483647, %v1015_v60 }
0x10b8   :  { %1327 = vpow2.f32 %v1198_v34 }
0x10b9   :  { %v1028_v8 = vor.u32 1.1754944e-38, %v1027_v4  ;;  %vm1026_vm11 = vcmp.eq.f32.partialorder %v1025_v6, 8.507059e+37 }
0x10bd   :  { %v1326_v61 = vpop.eup %1325 }
0x10be   :  { %v1017_v62 = vmul.f32 %v1326_v61, %v1015_v60  ;;  %vm1022_vm1 = vweird.f32 %v1326_v61  ;;  %v1328_v10 = vpop.eup %1327 }
0x10bf   :  { %vm1023_vm10 = vmor %vm1021_vm2, %vm1022_vm1  ;;  %v949_v12 = vadd.f32 1.0, %v1328_v10 }
0x10c0   :  { %v1018_v63 = vsub.f32 1.0, %v1017_v62  ;;  %v1118_v62 = vld [vmem:[%s1648_s5] sm:$0xf] }
0x10c1   :  { %1329 = vrcp.f32 %v949_v12  ;;  %v961_v17 = vand.u32 2147483648, %v949_v12  ;;  %vm955_vm13 = vweird.f32 %v949_v12  ;;  %v959_v18 = vand.u32 2147483647, %v949_v12  ;;  %1205 = vmatpush.msk.msra.mxu0 %vm1128_vm5, %v1118_v62 }
0x10c2   :  { %v1019_v1 = vmul.f32 %v1326_v61, %v1018_v63 }
0x10c3   :  { %v962_v20 = vor.u32 1.1754944e-38, %v961_v17  ;;  %vm960_vm14 = vcmp.eq.f32.partialorder %v959_v18, 8.507059e+37 }
0x10c4   :  { %v1020_v2 = vadd.f32 %v1326_v61, %v1019_v1 }
0x10c6   :  { %v1024_v7 = vsel %vm1023_vm10, %v1326_v61, %v1020_v2  ;;  %v12_v2 = vstv %s1649_s6 }
0x10c7   :  { %v1029_v9 = vsel %vm1026_vm11, %v1028_v8, %v1024_v7  ;;  %v1330_v11 = vpop.eup %1329  ;;  %13 = vst [vmem:[#allocation2] sm:$0x1] %v12_v2 }
0x10c8   :  { %v951_v13 = vmul.f32 %v1330_v11, %v949_v12  ;;  %vm956_vm12 = vweird.f32 %v1330_v11  ;;  %v1032_v23 = vmul.f32 %v1029_v9, %v1591_v35 }
0x10c9   :  { %vm957_vm0 = vmor %vm955_vm13, %vm956_vm12 }
0x10ca   :  { %v952_v14 = vsub.f32 1.0, %v951_v13 }
0x10cc   :  { %v953_v15 = vmul.f32 %v1330_v11, %v952_v14 }
0x10ce   :  { %v954_v16 = vadd.f32 %v1330_v11, %v953_v15  ;;  %v1214_v6 = vld [vmem:[#allocation2] ss:$0 sm:$0xff] }
0x10d0   :  { %v958_v19 = vsel %vm957_vm0, %v1330_v11, %v954_v16 }
0x10d1   :  { %v963_v21 = vsel %vm960_vm14, %v962_v20, %v958_v19 }
0x10d2   :  { %v966_v26 = vmul.f32 %v963_v21, %v1596_v39 }
0x10e4   :  { %v1035_v5 = vpop.permute.xlu0 %1034 }
0x10e5   :  { %v1037_v3 = vmul.f32 %v1035_v5, %v1029_v9 }
0x10e7   :  { %1039 = vrot.lane.b32.xlu2 %v1037_v3, %s1346_s30 }
0x110e   :  { %v969_v22 = vpop.permute.xlu2 %968 }
0x110f   :  { %v971_v28 = vmul.f32 %v969_v22, %v963_v21 }
0x1111   :  { %973 = vrot.lane.b32.xlu1 %v971_v28, %s1346_s30 }
0x1141   :  { %v1040_v24 = vpop.permute.xlu2 %1039 }
0x1142   :  { %v1042_v25 = vadd.f32 %v1040_v24, %v1032_v23 }
0x1144   :  { %1331 = vtanh.f32 %v1042_v25 }
0x114a   :  { %v1332_v0 = vpop.eup %1331 }
0x114b   :  { %1045 = vrot.lane.b32.xlu1 %v1332_v0, %s1347_s8 }
0x1183   :  { %v974_v27 = vpop.permute.xlu1 %973 }
0x1184   :  { %v976_v29 = vadd.f32 %v974_v27, %v966_v26 }
0x1186   :  { %1333 = vtanh.f32 %v976_v29 }
0x118c   :  { %v1334_v30 = vpop.eup %1333 }
0x118d   :  { %979 = vrot.lane.b32.xlu0 %v1334_v30, %s1347_s8 }
0x11bd   :  { %v1046_v31 = vpop.permute.xlu1 %1045 }
0x11be   :  { %v1048_v32 = vmul.f32 %v1046_v31, %v1029_v9 }
0x11c0   :  { %1050 = vrot.lane.b32.xlu2 %v1048_v32, %s1348_s9 }
0x11ff   :  { %v980_v33 = vpop.permute.xlu0 %979 }
0x1200   :  { %v982_v35 = vmul.f32 %v980_v33, %v963_v21 }
0x1202   :  { %1054 = vrot.lane.b32.xlu0 %v982_v35, %s1345_s29 }
0x121a   :  { %v1051_v36 = vpop.permute.xlu2 %1050 }
0x1274   :  { %v1055_v37 = vpop.permute.xlu0 %1054 }
0x1275   :  { %v1057_v38 = vsel %vm107_vm7, %v1051_v36, %v1055_v37 }
0x1276   :  { %1203 = vmatmul.msk.f32.vlgmr.msrb.gmra.mxu3 %vm112_vm8, %v1057_v38 }
0x12f9   :  { %v1078_v39 = vpop.f32.mrf.mxu3 }
0x12fa   :  { %v1079_v41 = vadd.f32 %v1344_v40, %v1078_v39 }
0x12fc   :  { %1335 = vtanh.f32 %v1079_v41  ;;  %v1204_v43 = vmul.f32 -1.442695, %v1079_v41 }
0x12fe   :  { %1337 = vpow2.f32 %v1204_v43 }
0x1302   :  { %v1336_v42 = vpop.eup %1335 }
0x1303   :  { %1103 = vrot.lane.b32.xlu1 %v1336_v42, %s1345_s29 }
0x1304   :  { %v1338_v44 = vpop.eup %1337 }
0x1305   :  { %v1084_v45 = vadd.f32 1.0, %v1338_v44 }
0x1307   :  { %1339 = vrcp.f32 %v1084_v45  ;;  %v1096_v51 = vand.u32 2147483648, %v1084_v45  ;;  %vm1090_vm15 = vweird.f32 %v1084_v45  ;;  %v1094_v52 = vand.u32 2147483647, %v1084_v45 }
0x1309   :  { %v1097_v54 = vor.u32 1.1754944e-38, %v1096_v51  ;;  %vm1095_vm4 = vcmp.eq.f32.partialorder %v1094_v52, 8.507059e+37 }
0x130d   :  { %v1340_v46 = vpop.eup %1339 }
0x130e   :  { %v1086_v47 = vmul.f32 %v1340_v46, %v1084_v45  ;;  %vm1091_vm8 = vweird.f32 %v1340_v46 }
0x130f   :  { %vm1092_vm3 = vmor %vm1090_vm15, %vm1091_vm8 }
0x1310   :  { %v1087_v48 = vsub.f32 1.0, %v1086_v47 }
0x1312   :  { %v1088_v49 = vmul.f32 %v1340_v46, %v1087_v48 }
0x1314   :  { %v1089_v50 = vadd.f32 %v1340_v46, %v1088_v49 }
0x1316   :  { %v1093_v53 = vsel %vm1092_vm3, %v1340_v46, %v1089_v50 }
0x1317   :  { %v1098_v56 = vsel %vm1095_vm4, %v1097_v54, %v1093_v53 }
0x1318   :  { %v1101_v58 = vmul.f32 %v1098_v56, %v976_v29 }
0x1375   :  { %v1104_v55 = vpop.permute.xlu1 %1103 }
0x1376   :  { %v1106_v57 = vmul.f32 %v1104_v55, %v1098_v56 }
0x1378   :  { %1108 = vrot.lane.b32.xlu2 %v1106_v57, %s1346_s30 }
0x13d2   :  { %v1109_v59 = vpop.permute.xlu2 %1108 }
0x13d3   :  { %v1111_v60 = vadd.f32 %v1109_v59, %v1101_v58 }
0x13d5   :  { %1341 = vtanh.f32 %v1111_v60 }
0x13db   :  { %v1342_v61 = vpop.eup %1341 }
0x13dc   :  { %1114 = vrot.lane.b32.xlu0 %v1342_v61, %s1347_s8 }
0x144e   :  { %v1115_v63 = vpop.permute.xlu0 %1114 }
0x144f   :  { %v1117_v1 = vmul.f32 %v1115_v63, %v1098_v56 }
0x1451   :  { %1124 = vrot.lane.b32.xlu1 %v1117_v1, %s1348_s9 }
0x14c3   :  { %v1125_v4 = vpop.permute.xlu1 %1124 }
0x14c4   :  { %1206 = vmatmul.msk.f32.vlgmr.msra.gmra.mxu0 %vm107_vm7, %v1125_v4 }
0x1541   :  { %v1149_v34 = vpop.f32.mrf.mxu0 }
0x1542   :  { %v1150_v7 = vadd.f32 %v1214_v6, %v1149_v34 }
0x1544   :  { %1153 = vst.msk [vmem:[%s1650_s7] sm:$0x3] %vm1152_vm6, %v1150_v7 }

</bundles_post_ra>
